<compile_context>
chip_gen: v5e
topology: v5e:2x2
jax: 0.10.0
libtpu: 0.0.40
codegen_flags: <defaults>
</compile_context>

<pallas_src>
import jax
import jax.numpy as jnp
from jax import lax
from jax.experimental import pallas as pl
from jax.experimental.pallas import tpu as pltpu


_VMEM_TARGET = 40 * 1024 * 1024   # leave headroom on v7x's 64 MiB VMEM


def _round_up(x, m):
    return ((x + m - 1) // m) * m


def _select_tiles(B, D_pad, itemsize, block_q, block_k):
    """Pick (bq, bk, B_pad, vmem_need); bq is a multiple of bk, B_pad of bq."""
    bk = min(_round_up(block_k, 128), _round_up(B, 128))
    if block_q is None:
        bq = min(512, _round_up(B, 128))
        bq = max(bk, (bq // bk) * bk)
        # v7x megacore: the row axis is the "parallel" one — keep >= 2 row
        # tiles when the batch spans them so both TensorCores get work.
        if _round_up(B, bq) == bq and bq >= 2 * bk:
            bq = max(bk, (bq // (2 * bk)) * bk)
    else:
        bq = min(max(block_q, bk), _round_up(B, bk))
        bq = max(bk, (bq // bk) * bk)

    def vmem_need(bq_):
        # Double-buffered feature blocks + label/bias blocks (lane/sublane
        # padded) + output block, plus single-buffered (bq,1) f32 scratch.
        return (2 * ((bq_ + bk) * D_pad * itemsize
                     + (bq_ + bk) * 128 * 4
                     + bq_ * 128 * 4)
                + 4 * bq_ * 128 * 4)

    while bq > bk and vmem_need(bq) > _VMEM_TARGET:
        bq -= bk
    B_pad = _round_up(B, bq)
    return bq, bk, B_pad, vmem_need(bq)


def _con_loss_kernel(fq_ref, fk_ref, lq_ref, lk_ref, bias_ref, out_ref,
                     m_sc, l_sc, a_sc, c_sc):
    i = pl.program_id(0)          # row (anchor) tile  -- "parallel"
    j = pl.program_id(1)          # column tile        -- reduction ("arbitrary")
    bq = fq_ref.shape[0]
    bk = fk_ref.shape[0]

    @pl.when(j == 0)
    def _init():
        m_sc[...] = jnp.full_like(m_sc, -jnp.inf)
        l_sc[...] = jnp.zeros_like(l_sc)
        a_sc[...] = jnp.zeros_like(a_sc)
        c_sc[...] = jnp.zeros_like(c_sc)

    # Logits tile on the MXU: contraction over the (padded, lane-dense)
    # feature dim of both operands (transposed-RHS matmul, no relayout);
    # 1/temperature is already folded into the (bf16) features.
    s = lax.dot_general(
        fq_ref[...], fk_ref[...],
        dimension_numbers=(((1,), (1,)), ((), ())),
        preferred_element_type=jnp.float32,
    )                                                            # (bq, bk) f32

    # Padded columns: additive -1e9 bias streamed per column tile.
    s = s + bias_ref[...]

    # Self-similarity kill: vector iotas + one broadcast compare + one select
    # per element (replaces the old (bq,bk) iota/int-add/OR epilogue).
    row_ids = i * bq + lax.broadcasted_iota(jnp.int32, (bq, 1), 0)
    col_ids = j * bk + lax.broadcasted_iota(jnp.int32, (1, bk), 1)
    s = jnp.where(row_ids == col_ids, jnp.float32(-1e9), s)

    # Positive-pair mask: same label AND the logit survived the kill
    # (diag + padded columns sit at ~-1e9, so `s > -1e8` excludes them).
    pos = ((lq_ref[...] == lk_ref[...]) & (s > -1e8)).astype(jnp.float32)

    # Online logsumexp over columns.
    m_new = jnp.maximum(m_sc[...], jnp.max(s, axis=-1, keepdims=True))
    alpha = jnp.exp(m_sc[...] - m_new)
    l_sc[...] = alpha * l_sc[...] + jnp.sum(jnp.exp(s - m_new),
                                            axis=-1, keepdims=True)
    m_sc[...] = m_new

    # Accumulate sum_j mask*logit and the positive counts.
    a_sc[...] += jnp.sum(pos * s, axis=-1, keepdims=True)
    c_sc[...] += jnp.sum(pos, axis=-1, keepdims=True)

    @pl.when(j == pl.num_programs(1) - 1)
    def _finalize():
        lse = m_sc[...] + jnp.log(l_sc[...])
        denom = jnp.maximum(c_sc[...], 1.0)
        # sum_j p_ij * log_softmax(s)_ij == (A_i - C_i * lse_i) / max(C_i, 1)
        contrib = (a_sc[...] - c_sc[...] * lse) / denom          # (bq, 1)
        out_ref[...] = jnp.broadcast_to(contrib, out_ref.shape)  # lane-dense


def con_loss(feats, labels, temperature=0.1, block_q=None, block_k=256,
             compute_dtype=jnp.bfloat16):
    """Multi-positive contrastive loss (forward) via a tiled Pallas kernel."""
    B, D = feats.shape
    D_pad = _round_up(D, 128)
    itemsize = jnp.dtype(compute_dtype).itemsize
    bq, bk, B_pad, vmem_need = _select_tiles(B, D_pad, itemsize,
                                             block_q, block_k)

    # Fold 1/temperature into the feature cast: (c*f)(c*f)^T = f f^T / T with
    # c = T**-0.5, so the kernel has no per-element temperature multiply and
    # the features stream in bf16 (half HBM traffic / VMEM, MXU-native rate).
    scale = float(temperature) ** -0.5
    feats_p = jnp.pad((feats.astype(jnp.float32) * scale).astype(compute_dtype),
                      ((0, B_pad - B), (0, D_pad - D)))

    pad_label = jnp.iinfo(jnp.int32).min       # cannot collide with user labels
    labels_p = jnp.pad(labels.astype(jnp.int32).reshape(-1), (0, B_pad - B),
                       constant_values=pad_label)
    labels_q = labels_p.reshape(B_pad, 1)
    labels_k = labels_p.reshape(1, B_pad)

    # Additive -1e9 bias on padded columns (replaces per-tile col_idx >= batch).
    col_bias = jnp.where(jnp.arange(B_pad) >= B, -1e9, 0.0
                         ).astype(jnp.float32).reshape(1, B_pad)

    n_q = B_pad // bq
    n_k = B_pad // bk

    vmem_limit = int(min(max(2 * vmem_need, 16 << 20), _VMEM_TARGET))
    if vmem_need > vmem_limit:
        # Very large D with bq == bk already: exceeds the v7x comfort zone.
        # TODO(synk): add a feature-chunk grid axis with an f32 partial-logit
        # accumulator instead of raising the limit.
        vmem_limit = int(vmem_need * 1.25)

    per_row = pl.pallas_call(
        _con_loss_kernel,
        out_shape=jax.ShapeDtypeStruct((B_pad, 128), jnp.float32),
        grid_spec=pltpu.PrefetchScalarGridSpec(
            num_scalar_prefetch=0,
            grid=(n_q, n_k),
            in_specs=[
                pl.BlockSpec((bq, D_pad), lambda i, j: (i, 0)),  # row feats (resident over j)
                pl.BlockSpec((bk, D_pad), lambda i, j: (j, 0)),  # col feats (streamed)
                pl.BlockSpec((bq, 1), lambda i, j: (i, 0)),      # row labels
                pl.BlockSpec((1, bk), lambda i, j: (0, j)),      # col labels
                pl.BlockSpec((1, bk), lambda i, j: (0, j)),      # col pad bias
            ],
            out_specs=pl.BlockSpec((bq, 128), lambda i, j: (i, 0)),
            scratch_shapes=[pltpu.VMEM((bq, 1), jnp.float32)
                            for _ in range(4)],                   # m, l, A, C
        ),
        compiler_params=pltpu.CompilerParams(
            dimension_semantics=("parallel", "arbitrary"),
            vmem_limit_bytes=vmem_limit,
        ),
    )(feats_p, feats_p, labels_q, labels_k, col_bias)

    # Per-row sum_j p*log_q is broadcast across lanes; take lane 0 of the real
    # rows and negate the mean (rows with no positives contribute 0 but still
    # count in the denominator, matching the PyTorch module).
    return -jnp.sum(per_row[:B, 0]) / B


def con_loss_ref(feats, labels, temperature=0.1):
    """Pure-JAX reference mirroring the PyTorch forward."""
    feats = feats.astype(jnp.float32)
    B = feats.shape[0]
    eq_mask = (labels[:, None] == labels[None, :]).astype(jnp.float32)
    logits_mask = 1.0 - jnp.eye(B, dtype=jnp.float32)
    mask = eq_mask * logits_mask
    logits = (feats @ feats.T) / temperature
    logits = logits - (1.0 - logits_mask) * 1e9
    logits = logits - jnp.max(logits, axis=-1, keepdims=True)
    log_q = jax.nn.log_softmax(logits, axis=-1)
    p = mask / jnp.maximum(jnp.sum(mask, axis=1, keepdims=True), 1.0)
    return -jnp.mean(jnp.sum(p * log_q, axis=-1))


if __name__ == "__main__":
    key = jax.random.PRNGKey(0)
    k1, k2, k3, k4 = jax.random.split(key, 4)

    # Test 1: tiny single-tile problem, f32 compute path, tight tolerance.
    B, D = 8, 32
    feats = jax.random.normal(k1, (B, D), dtype=jnp.float32)
    labels = jax.random.randint(k2, (B,), 0, 3, dtype=jnp.int32)
    loss = jax.block_until_ready(
        con_loss(feats, labels, temperature=0.1, compute_dtype=jnp.float32))
    ref = jax.block_until_ready(con_loss_ref(feats, labels, temperature=0.1))
    assert jnp.allclose(loss, ref, rtol=1e-4, atol=1e-4), (loss, ref)

    # Test 2: decoupled row/col tiles (bq=256, bk=128 -> grid (1, 2)), bf16
    # feature streaming (default), L2-normalized features (typical usage).
    B2, D2 = 160, 48
    feats2 = jax.random.normal(k3, (B2, D2), dtype=jnp.float32)
    feats2 = feats2 / jnp.linalg.norm(feats2, axis=-1, keepdims=True)
    labels2 = jax.random.randint(k4, (B2,), 0, 6, dtype=jnp.int32)
    loss2 = jax.block_until_ready(
        con_loss(feats2, labels2, temperature=0.1, block_q=256, block_k=128))
    ref2 = jax.block_until_ready(con_loss_ref(feats2, labels2, temperature=0.1))
    assert jnp.allclose(loss2, ref2, rtol=2e-2, atol=2e-2), (loss2, ref2)

    # Test 3: 2x2 grid (multiple row tiles exercise the parallel axis and the
    # online-softmax accumulators), f32 compute path, tight tolerance.
    loss3 = jax.block_until_ready(
        con_loss(feats2, labels2, temperature=0.1, block_q=128, block_k=128,
                 compute_dtype=jnp.float32))
    assert jnp.allclose(loss3, ref2, rtol=1e-4, atol=1e-4), (loss3, ref2)

    print("KERNEL_OK")
</pallas_src>

<mosaic_0001>
module attributes {stable_mosaic.version = 11 : i64} {
  func.func @_con_loss_kernel(%arg0: i32, %arg1: i32, %arg2: memref<128x128xf32, #tpu.memory_space<vmem>>, %arg3: memref<128x128xf32, #tpu.memory_space<vmem>>, %arg4: memref<128x1xi32, #tpu.memory_space<vmem>>, %arg5: memref<1x128xi32, #tpu.memory_space<vmem>>, %arg6: memref<1x128xf32, #tpu.memory_space<vmem>>, %arg7: memref<128x128xf32, #tpu.memory_space<vmem>>, %arg8: memref<128x1xf32, #tpu.memory_space<vmem>>, %arg9: memref<128x1xf32, #tpu.memory_space<vmem>>, %arg10: memref<128x1xf32, #tpu.memory_space<vmem>>, %arg11: memref<128x1xf32, #tpu.memory_space<vmem>>) attributes {dimension_semantics = [#tpu.dimension_semantics<parallel>, #tpu.dimension_semantics<arbitrary>], iteration_bounds = array<i64: 1, 1>, scalar_prefetch = 0 : i64, scratch_operands = 4 : i64, tpu.core_type = #tpu.core_type<tc>, window_params = [{transform_indices = @transform_0, window_bounds = array<i64: 128, 128>}, {transform_indices = @transform_1, window_bounds = array<i64: 128, 128>}, {transform_indices = @transform_2, window_bounds = array<i64: 128, 1>}, {transform_indices = @transform_3, window_bounds = array<i64: 1, 128>}, {transform_indices = @transform_4, window_bounds = array<i64: 1, 128>}, {transform_indices = @transform_5, window_bounds = array<i64: 128, 128>}]} {
    %c0_i32 = arith.constant 0 : i32
    %0 = arith.cmpi eq, %arg1, %c0_i32 : i32
    %1 = arith.extui %0 : i1 to i32
    %c0_i32_0 = arith.constant 0 : i32
    %2 = arith.cmpi ne, %1, %c0_i32_0 : i32
    scf.if %2 {
      %cst_37 = arith.constant 0xFF800000 : f32
      %63 = vector.broadcast %cst_37 : f32 to vector<128x1xf32>
      %c0_38 = arith.constant 0 : index
      %c0_39 = arith.constant 0 : index
      %64 = vector.load %arg8[%c0_38, %c0_39] : memref<128x1xf32, #tpu.memory_space<vmem>>, vector<128x1xf32>
      tpu.vector_store %arg8[%c0_38, %c0_39], %63 {strides = array<i32>} : memref<128x1xf32, #tpu.memory_space<vmem>>, vector<128x1xf32>,
      %cst_40 = arith.constant 0.000000e+00 : f32
      %65 = vector.broadcast %cst_40 : f32 to vector<128x1xf32>
      %c0_41 = arith.constant 0 : index
      %c0_42 = arith.constant 0 : index
      %66 = vector.load %arg9[%c0_41, %c0_42] : memref<128x1xf32, #tpu.memory_space<vmem>>, vector<128x1xf32>
      tpu.vector_store %arg9[%c0_41, %c0_42], %65 {strides = array<i32>} : memref<128x1xf32, #tpu.memory_space<vmem>>, vector<128x1xf32>,
      %cst_43 = arith.constant 0.000000e+00 : f32
      %67 = vector.broadcast %cst_43 : f32 to vector<128x1xf32>
      %c0_44 = arith.constant 0 : index
      %c0_45 = arith.constant 0 : index
      %68 = vector.load %arg10[%c0_44, %c0_45] : memref<128x1xf32, #tpu.memory_space<vmem>>, vector<128x1xf32>
      tpu.vector_store %arg10[%c0_44, %c0_45], %67 {strides = array<i32>} : memref<128x1xf32, #tpu.memory_space<vmem>>, vector<128x1xf32>,
      %cst_46 = arith.constant 0.000000e+00 : f32
      %69 = vector.broadcast %cst_46 : f32 to vector<128x1xf32>
      %c0_47 = arith.constant 0 : index
      %c0_48 = arith.constant 0 : index
      %70 = vector.load %arg11[%c0_47, %c0_48] : memref<128x1xf32, #tpu.memory_space<vmem>>, vector<128x1xf32>
      tpu.vector_store %arg11[%c0_47, %c0_48], %69 {strides = array<i32>} : memref<128x1xf32, #tpu.memory_space<vmem>>, vector<128x1xf32>,
    } else {
    }
    %c0 = arith.constant 0 : index
    %c0_1 = arith.constant 0 : index
    %3 = vector.load %arg2[%c0, %c0_1] : memref<128x128xf32, #tpu.memory_space<vmem>>, vector<128x128xf32>
    %c0_2 = arith.constant 0 : index
    %c0_3 = arith.constant 0 : index
    %4 = vector.load %arg3[%c0_2, %c0_3] : memref<128x128xf32, #tpu.memory_space<vmem>>, vector<128x128xf32>
    %cst = arith.constant dense<0.000000e+00> : vector<128x128xf32>
    %5 = tpu.matmul %3, %4, %cst {dimension_numbers = #tpu.dot_dimension_numbers<[1], [1], [0], [0], [0, 0, 1, 0], [], []>} : vector<128x128xf32>, vector<128x128xf32>, vector<128x128xf32> -> vector<128x128xf32>
    %c0_4 = arith.constant 0 : index
    %c0_5 = arith.constant 0 : index
    %6 = vector.load %arg6[%c0_4, %c0_5] : memref<1x128xf32, #tpu.memory_space<vmem>>, vector<1x128xf32>
    %7 = vector.broadcast %6 : vector<1x128xf32> to vector<128x128xf32>
    %8 = arith.addf %5, %7 : vector<128x128xf32>
    %c128_i32 = arith.constant 128 : i32
    %9 = arith.muli %arg0, %c128_i32 : i32
    %10 = tpu.iota {dimensions = array<i32: 0>} : vector<128x1xi32>
    %11 = vector.broadcast %9 : i32 to vector<128x1xi32>
    %12 = arith.addi %11, %10 : vector<128x1xi32>
    %c128_i32_6 = arith.constant 128 : i32
    %13 = arith.muli %arg1, %c128_i32_6 : i32
    %14 = tpu.iota {dimensions = array<i32: 1>} : vector<1x128xi32>
    %15 = vector.broadcast %13 : i32 to vector<1x128xi32>
    %16 = arith.addi %15, %14 : vector<1x128xi32>
    %17 = vector.broadcast %12 : vector<128x1xi32> to vector<128x128xi32>
    %18 = vector.broadcast %16 : vector<1x128xi32> to vector<128x128xi32>
    %19 = arith.cmpi eq, %17, %18 : vector<128x128xi32>
    %cst_7 = arith.constant -1.000000e+09 : f32
    %20 = vector.broadcast %cst_7 : f32 to vector<128x128xf32>
    %21 = arith.select %19, %20, %8 : vector<128x128xi1>, vector<128x128xf32>
    %c0_8 = arith.constant 0 : index
    %c0_9 = arith.constant 0 : index
    %22 = vector.load %arg4[%c0_8, %c0_9] : memref<128x1xi32, #tpu.memory_space<vmem>>, vector<128x1xi32>
    %c0_10 = arith.constant 0 : index
    %c0_11 = arith.constant 0 : index
    %23 = vector.load %arg5[%c0_10, %c0_11] : memref<1x128xi32, #tpu.memory_space<vmem>>, vector<1x128xi32>
    %24 = vector.broadcast %22 : vector<128x1xi32> to vector<128x128xi32>
    %25 = vector.broadcast %23 : vector<1x128xi32> to vector<128x128xi32>
    %26 = arith.cmpi eq, %24, %25 : vector<128x128xi32>
    %cst_12 = arith.constant -1.000000e+08 : f32
    %27 = vector.broadcast %cst_12 : f32 to vector<128x128xf32>
    %28 = arith.cmpf ogt, %21, %27 : vector<128x128xf32>
    %29 = arith.andi %26, %28 : vector<128x128xi1>
    %30 = arith.extui %29 : vector<128x128xi1> to vector<128x128xi32>
    %31 = arith.sitofp %30 : vector<128x128xi32> to vector<128x128xf32>
    %c0_13 = arith.constant 0 : index
    %c0_14 = arith.constant 0 : index
    %32 = vector.load %arg8[%c0_13, %c0_14] : memref<128x1xf32, #tpu.memory_space<vmem>>, vector<128x1xf32>
    %cst_15 = arith.constant dense<0xFF800000> : vector<128xf32>
    %33 = vector.multi_reduction <maximumf>, %21, %cst_15 [1] : vector<128x128xf32> to vector<128xf32>
    %34 = vector.shape_cast %33 : vector<128xf32> to vector<128x1xf32>
    %35 = arith.maximumf %32, %34 : vector<128x1xf32>
    %c0_16 = arith.constant 0 : index
    %c0_17 = arith.constant 0 : index
    %36 = vector.load %arg8[%c0_16, %c0_17] : memref<128x1xf32, #tpu.memory_space<vmem>>, vector<128x1xf32>
    %37 = arith.subf %36, %35 : vector<128x1xf32>
    %38 = math.exp %37 : vector<128x1xf32>
    %c0_18 = arith.constant 0 : index
    %c0_19 = arith.constant 0 : index
    %39 = vector.load %arg9[%c0_18, %c0_19] : memref<128x1xf32, #tpu.memory_space<vmem>>, vector<128x1xf32>
    %40 = arith.mulf %38, %39 : vector<128x1xf32>
    %41 = vector.broadcast %35 : vector<128x1xf32> to vector<128x128xf32>
    %42 = arith.subf %21, %41 : vector<128x128xf32>
    %43 = math.exp %42 : vector<128x128xf32>
    %cst_20 = arith.constant dense<0.000000e+00> : vector<128xf32>
    %44 = vector.multi_reduction <add>, %43, %cst_20 [1] : vector<128x128xf32> to vector<128xf32>
    %45 = vector.shape_cast %44 : vector<128xf32> to vector<128x1xf32>
    %46 = arith.addf %40, %45 : vector<128x1xf32>
    %c0_21 = arith.constant 0 : index
    %c0_22 = arith.constant 0 : index
    %47 = vector.load %arg9[%c0_21, %c0_22] : memref<128x1xf32, #tpu.memory_space<vmem>>, vector<128x1xf32>
    tpu.vector_store %arg9[%c0_21, %c0_22], %46 {strides = array<i32>} : memref<128x1xf32, #tpu.memory_space<vmem>>, vector<128x1xf32>,
    %c0_23 = arith.constant 0 : index
    %c0_24 = arith.constant 0 : index
    %48 = vector.load %arg8[%c0_23, %c0_24] : memref<128x1xf32, #tpu.memory_space<vmem>>, vector<128x1xf32>
    tpu.vector_store %arg8[%c0_23, %c0_24], %35 {strides = array<i32>} : memref<128x1xf32, #tpu.memory_space<vmem>>, vector<128x1xf32>,
    %c0_25 = arith.constant 0 : index
    %c0_26 = arith.constant 0 : index
    %49 = vector.load %arg10[%c0_25, %c0_26] : memref<128x1xf32, #tpu.memory_space<vmem>>, vector<128x1xf32>
    %50 = arith.mulf %31, %21 : vector<128x128xf32>
    %cst_27 = arith.constant dense<0.000000e+00> : vector<128xf32>
    %51 = vector.multi_reduction <add>, %50, %cst_27 [1] : vector<128x128xf32> to vector<128xf32>
    %52 = vector.shape_cast %51 : vector<128xf32> to vector<128x1xf32>
    %53 = arith.addf %49, %52 : vector<128x1xf32>
    %c0_28 = arith.constant 0 : index
    %c0_29 = arith.constant 0 : index
    %54 = vector.load %arg10[%c0_28, %c0_29] : memref<128x1xf32, #tpu.memory_space<vmem>>, vector<128x1xf32>
    tpu.vector_store %arg10[%c0_28, %c0_29], %53 {strides = array<i32>} : memref<128x1xf32, #tpu.memory_space<vmem>>, vector<128x1xf32>,
    %c0_30 = arith.constant 0 : index
    %c0_31 = arith.constant 0 : index
    %55 = vector.load %arg11[%c0_30, %c0_31] : memref<128x1xf32, #tpu.memory_space<vmem>>, vector<128x1xf32>
    %cst_32 = arith.constant dense<0.000000e+00> : vector<128xf32>
    %56 = vector.multi_reduction <add>, %31, %cst_32 [1] : vector<128x128xf32> to vector<128xf32>
    %57 = vector.shape_cast %56 : vector<128xf32> to vector<128x1xf32>
    %58 = arith.addf %55, %57 : vector<128x1xf32>
    %c0_33 = arith.constant 0 : index
    %c0_34 = arith.constant 0 : index
    %59 = vector.load %arg11[%c0_33, %c0_34] : memref<128x1xf32, #tpu.memory_space<vmem>>, vector<128x1xf32>
    tpu.vector_store %arg11[%c0_33, %c0_34], %58 {strides = array<i32>} : memref<128x1xf32, #tpu.memory_space<vmem>>, vector<128x1xf32>,
    %c0_i32_35 = arith.constant 0 : i32
    %60 = arith.cmpi eq, %arg1, %c0_i32_35 : i32
    %61 = arith.extui %60 : i1 to i32
    %c0_i32_36 = arith.constant 0 : i32
    %62 = arith.cmpi ne, %61, %c0_i32_36 : i32
    scf.if %62 {
      %c0_37 = arith.constant 0 : index
      %c0_38 = arith.constant 0 : index
      %63 = vector.load %arg8[%c0_37, %c0_38] : memref<128x1xf32, #tpu.memory_space<vmem>>, vector<128x1xf32>
      %c0_39 = arith.constant 0 : index
      %c0_40 = arith.constant 0 : index
      %64 = vector.load %arg9[%c0_39, %c0_40] : memref<128x1xf32, #tpu.memory_space<vmem>>, vector<128x1xf32>
      %65 = math.log %64 : vector<128x1xf32>
      %66 = arith.addf %63, %65 : vector<128x1xf32>
      %c0_41 = arith.constant 0 : index
      %c0_42 = arith.constant 0 : index
      %67 = vector.load %arg11[%c0_41, %c0_42] : memref<128x1xf32, #tpu.memory_space<vmem>>, vector<128x1xf32>
      %cst_43 = arith.constant 1.000000e+00 : f32
      %68 = vector.broadcast %cst_43 : f32 to vector<128x1xf32>
      %69 = arith.maximumf %67, %68 : vector<128x1xf32>
      %c0_44 = arith.constant 0 : index
      %c0_45 = arith.constant 0 : index
      %70 = vector.load %arg10[%c0_44, %c0_45] : memref<128x1xf32, #tpu.memory_space<vmem>>, vector<128x1xf32>
      %c0_46 = arith.constant 0 : index
      %c0_47 = arith.constant 0 : index
      %71 = vector.load %arg11[%c0_46, %c0_47] : memref<128x1xf32, #tpu.memory_space<vmem>>, vector<128x1xf32>
      %72 = arith.mulf %71, %66 : vector<128x1xf32>
      %73 = arith.subf %70, %72 : vector<128x1xf32>
      %74 = arith.divf %73, %69 : vector<128x1xf32>
      %75 = vector.shape_cast %74 : vector<128x1xf32> to vector<128x1xf32>
      %76 = vector.broadcast %75 : vector<128x1xf32> to vector<128x128xf32>
      %c0_48 = arith.constant 0 : index
      %c0_49 = arith.constant 0 : index
      %77 = vector.load %arg7[%c0_48, %c0_49] : memref<128x128xf32, #tpu.memory_space<vmem>>, vector<128x128xf32>
      tpu.vector_store %arg7[%c0_48, %c0_49], %76 {strides = array<i32>} : memref<128x128xf32, #tpu.memory_space<vmem>>, vector<128x128xf32>,
    } else {
    }
    return
  }
  func.func @transform_0(%arg0: i32, %arg1: i32) -> (i32, i32) {
    %c0_i32 = arith.constant 0 : i32
    %c0_i32_0 = arith.constant 0 : i32
    return %arg0, %c0_i32 : i32, i32
  }
  func.func @transform_1(%arg0: i32, %arg1: i32) -> (i32, i32) {
    %c0_i32 = arith.constant 0 : i32
    %c0_i32_0 = arith.constant 0 : i32
    return %arg1, %c0_i32 : i32, i32
  }
  func.func @transform_2(%arg0: i32, %arg1: i32) -> (i32, i32) {
    %c0_i32 = arith.constant 0 : i32
    %c0_i32_0 = arith.constant 0 : i32
    return %arg0, %c0_i32 : i32, i32
  }
  func.func @transform_3(%arg0: i32, %arg1: i32) -> (i32, i32) {
    %c0_i32 = arith.constant 0 : i32
    %c0_i32_0 = arith.constant 0 : i32
    return %c0_i32, %arg1 : i32, i32
  }
  func.func @transform_4(%arg0: i32, %arg1: i32) -> (i32, i32) {
    %c0_i32 = arith.constant 0 : i32
    %c0_i32_0 = arith.constant 0 : i32
    return %c0_i32, %arg1 : i32, i32
  }
  func.func @transform_5(%arg0: i32, %arg1: i32) -> (i32, i32) {
    %c0_i32 = arith.constant 0 : i32
    %c0_i32_0 = arith.constant 0 : i32
    return %arg0, %c0_i32 : i32, i32
  }
}

</mosaic_0001>

<bundles_post_ra>
// kernel: tpu_custom_call.1
= control target key start
LH: loop header
LB: loop body
LE: loop exit
PB: predicated region body
PF: predicated region fallthrough
CT: control target
= control target key end

     0   :  { %10 = vsyncpa [#allocation7], 0  ;;  %s2971_s0 = inlined_call_operand.vmem [shape: f32[128,128], index: 0, kind: input, shape index: {}]   ;;  %s2972_s1 = inlined_call_operand.hbm [shape: f32[128,128], index: 1, kind: input, shape index: {}]   ;;  %s2973_s2 = inlined_call_operand.vmem [shape: s32[128,1], index: 2, kind: input, shape index: {}]   ;;  %s2974_s3 = inlined_call_operand.vmem [shape: s32[1,128], index: 3, kind: input, shape index: {}]   ;;  %s2975_s4 = inlined_call_operand.vmem [shape: f32[1,128], index: 4, kind: input, shape index: {}]   ;;  %s2976_s5 = inlined_call_operand.hbm [shape: f32[128,128], index: 5, kind: output, shape index: {}]  }
   0x1   :  { %11 = vsyncpa [#allocation8], 0  ;;  %s18_s20 = sshll.u32 %s2972_s1, 4  ;;  %s1728_s21 = smov [#allocation6]   ;;  %s19_s20 = int_to_ptr.hbm [resolvable:$true] %s18_s20 }
   0x2   :  { %s20_s22 = sshll.u32 %s1728_s21, 4  ;;  %s1729_s23 = smov 128   ;;  %s21_s22 = int_to_ptr.vmem [resolvable:$true] %s20_s22 }
   0x3   :  { %s1730_s24 = smov 8  }
   0x4   :  { %26 = dma.hbm_to_vmem [thread:$0]  %s19_s20, 2048, %s21_s22, [#allocation7], %s1729_s23, %s1729_s23, %s1730_s24  }
   0x5   :  { %1724 = dma.done.wait [#allocation7], 2048  }
   0x6   :  { %1725 = vsyncadd [#allocation7], 4294965248  ;;  %v137_v0 = vld [vmem:[#allocation6 + $0x78] sm:$0xff]  ;;  %v136_v1 = vld [vmem:[#allocation6 + $0x70] sm:$0xff]  ;;  %v1731_v2 = vmov 0   ;;  %v208_v49 = vlaneseq  ;;  %s1459_s19 = sshll.u32 %s2976_s5, 4  ;;  %s1460_s19 = int_to_ptr.hbm [resolvable:$true] %s1459_s19 }
   0x7   :  { %142 = vmatpush.xpose.msra.mxu0 %v137_v0  ;;  %1488 = vmatpush.xpose.msra.mxu1 %v137_v0  ;;  %v135_v3 = vld [vmem:[#allocation6 + $0x68] sm:$0xff]  ;;  %v279_v4 = vld [vmem:[%s2973_s2] sm:$0xff]  ;;  %v133_v6 = vld [vmem:[#allocation6 + $0x58] sm:$0xff] }
   0x8   :  { %1489 = vmatpush.xpose.msra.mxu2 %v137_v0  ;;  %1490 = vmatpush.xpose.msra.mxu3 %v137_v0  ;;  %v134_v5 = vld [vmem:[#allocation6 + $0x60] sm:$0xff]  ;;  %v280_v7 = vld [vmem:[%s2973_s2 + $0x8] sm:$0xff]  ;;  %v132_v8 = vld [vmem:[#allocation6 + $0x50] sm:$0xff]  ;;  %v1867_v51 = vshrl.u32 %v208_v49, 7  ;;  %v1869_v52 = vand.u32 127, %v208_v49 }
   0x9   :  { %1543 = vset.pattern.permute.xlu0 %v1731_v2  ;;  %1545 = vset.pattern.permute.xlu2 %v1731_v2  ;;  %v131_v9 = vld [vmem:[#allocation6 + $0x48] sm:$0xff]  ;;  %v285_v10 = vld [vmem:[%s2973_s2 + $0x30] sm:$0xff]  ;;  %v130_v11 = vld [vmem:[#allocation6 + $0x40] sm:$0xff] }
   0xa   :  { %1544 = vset.pattern.permute.xlu1 %v1731_v2  ;;  %297 = vperm.xlu0 %1543, %v279_v4   ;;  %v129_v12 = vld [vmem:[#allocation6 + $0x38] sm:$0xff]  ;;  %v288_v13 = vld [vmem:[%s2973_s2 + $0x48] sm:$0xff]  ;;  %v283_v14 = vld [vmem:[%s2973_s2 + $0x20] sm:$0xff]  ;;  %v1872_v53 = vadd.s32 112, %v1867_v51  ;;  %v1875_v54 = vadd.s32 80, %v1867_v51  ;;  %v213_v56 = vadd.s32 32, %v1867_v51  ;;  %vm247_vm2 = vcmp.eq.s32.totalorder %v1867_v51, %v1869_v52 }
   0xb   :  { %143 = vmatpush.xpose.msra.mxu0 %v136_v1  ;;  %1491 = vmatpush.xpose.msra.mxu1 %v136_v1  ;;  %v128_v15 = vld [vmem:[#allocation6 + $0x30] sm:$0xff]  ;;  %v291_v16 = vld [vmem:[%s2973_s2 + $0x60] sm:$0xff]  ;;  %v127_v17 = vld [vmem:[#allocation6 + $0x28] sm:$0xff]  ;;  %v1895_v60 = vadd.s32 88, %v1867_v51  ;;  %v1898_v61 = vadd.s32 120, %v1867_v51  ;;  %v1912_v2 = vadd.s32 24, %v1867_v51 }
   0xc   :  { %1492 = vmatpush.xpose.msra.mxu2 %v136_v1  ;;  %1493 = vmatpush.xpose.msra.mxu3 %v136_v1  ;;  %v284_v18 = vld [vmem:[%s2973_s2 + $0x28] sm:$0xff]  ;;  %v281_v19 = vld [vmem:[%s2973_s2 + $0x10] sm:$0xff]  ;;  %v126_v20 = vld [vmem:[#allocation6 + $0x20] sm:$0xff]  ;;  %vm261_vm0 = vcmp.eq.s32.totalorder %v1872_v53, %v1869_v52  ;;  %vm257_vm1 = vcmp.eq.s32.totalorder %v1875_v54, %v1869_v52  ;;  %vm251_vm3 = vcmp.eq.s32.totalorder %v213_v56, %v1869_v52 }
   0xd   :  { %309 = vperm.xlu2 %1545, %v283_v14   ;;  %303 = vperm.xlu1 %1544, %v281_v19   ;;  %v294_v21 = vld [vmem:[%s2973_s2 + $0x78] sm:$0xff]  ;;  %v287_v23 = vld [vmem:[%s2973_s2 + $0x40] sm:$0xff]  ;;  %v124_v25 = vld [vmem:[#allocation6 + $0x10] sm:$0xff]  ;;  %vm258_vm4 = vcmp.eq.s32.totalorder %v1895_v60, %v1869_v52  ;;  %vm262_vm5 = vcmp.eq.s32.totalorder %v1898_v61, %v1869_v52  ;;  %vm250_vm10 = vcmp.eq.s32.totalorder %v1912_v2, %v1869_v52  ;;  %v222_v61 = vadd.s32 104, %v1867_v51 }
   0xe   :  { %v125_v22 = vld [vmem:[#allocation6 + $0x18] sm:$0xff]  ;;  %v123_v26 = vld [vmem:[#allocation6 + $0x8] sm:$0xff]  ;;  %v122_v29 = vld [vmem:[#allocation6] sm:$0xff] }
   0xf   :  { %144 = vmatpush.xpose.msra.mxu0 %v135_v3  ;;  %1494 = vmatpush.xpose.msra.mxu1 %v135_v3  ;;  %v282_v24 = vld [vmem:[%s2973_s2 + $0x18] sm:$0xff]  ;;  %v106_v30 = vld [vmem:[%s2971_s0] sm:$0xff]  ;;  %v293_v34 = vld [vmem:[%s2973_s2 + $0x70] sm:$0xff] }
  0x10   :  { %1495 = vmatpush.xpose.msra.mxu2 %v135_v3  ;;  %1496 = vmatpush.xpose.msra.mxu3 %v135_v3  ;;  %v290_v27 = vld [vmem:[%s2973_s2 + $0x58] sm:$0xff]  ;;  %v110_v31 = vld [vmem:[%s2971_s0 + $0x20] sm:$0xff]  ;;  %v289_v35 = vld [vmem:[%s2973_s2 + $0x50] sm:$0xff]  ;;  %v1915_v3 = vadd.s32 56, %v1867_v51 }
  0x11   :  { %v286_v28 = vld [vmem:[%s2973_s2 + $0x38] sm:$0xff]  ;;  %v114_v32 = vld [vmem:[%s2971_s0 + $0x40] sm:$0xff]  ;;  %v107_v36 = vld [vmem:[%s2971_s0 + $0x8] sm:$0xff] }
  0x12   :  { %300 = vperm.xlu0 %1543, %v280_v7   ;;  %v118_v33 = vld [vmem:[%s2971_s0 + $0x60] sm:$0xff]  ;;  %v111_v37 = vld [vmem:[%s2971_s0 + $0x28] sm:$0xff]  ;;  %v112_v41 = vld [vmem:[%s2971_s0 + $0x30] sm:$0xff]  ;;  %v217_v7 = vadd.s32 64, %v1867_v51  ;;  %vm254_vm11 = vcmp.eq.s32.totalorder %v1915_v3, %v1869_v52 }
  0x13   :  { %145 = vmatpush.xpose.msra.mxu0 %v134_v5  ;;  %1497 = vmatpush.xpose.msra.mxu1 %v134_v5  ;;  %v115_v38 = vld [vmem:[%s2971_s0 + $0x48] sm:$0xff]  ;;  %v108_v42 = vld [vmem:[%s2971_s0 + $0x10] sm:$0xff]  ;;  %v109_v45 = vld [vmem:[%s2971_s0 + $0x18] sm:$0xff] }
  0x14   :  { %1498 = vmatpush.xpose.msra.mxu2 %v134_v5  ;;  %1499 = vmatpush.xpose.msra.mxu3 %v134_v5  ;;  %v119_v39 = vld [vmem:[%s2971_s0 + $0x68] sm:$0xff]  ;;  %v116_v43 = vld [vmem:[%s2971_s0 + $0x50] sm:$0xff]  ;;  %v113_v46 = vld [vmem:[%s2971_s0 + $0x38] sm:$0xff]  ;;  %vm255_vm14 = vcmp.eq.s32.totalorder %v217_v7, %v1869_v52  ;;  %v218_v7 = vadd.s32 72, %v1867_v51 }
  0x15   :  { %312 = vperm.xlu2 %1545, %v284_v18   ;;  %306 = vperm.xlu1 %1544, %v282_v24   ;;  %v292_v40 = vld [vmem:[%s2973_s2 + $0x68] sm:$0xff]  ;;  %v120_v44 = vld [vmem:[%s2971_s0 + $0x70] sm:$0xff]  ;;  %v117_v47 = vld [vmem:[%s2971_s0 + $0x58] sm:$0xff]  ;;  %v210_v24 = vadd.s32 8, %v1867_v51 }
  0x16   :  { %v121_v48 = vld [vmem:[%s2971_s0 + $0x78] sm:$0xff]  ;;  %v1885_v57 = vld [vmem:[%s2975_s4] ss:$0 sm:$0xff] }
  0x17   :  { %146 = vmatpush.xpose.msra.mxu0 %v133_v6  ;;  %1500 = vmatpush.xpose.msra.mxu1 %v133_v6  ;;  %v1890_v58 = vld [vmem:[%s2974_s3] ss:$0 sm:$0xff]  ;;  %s1734_s3 = smov [#allocation9]  }
  0x18   :  { %1501 = vmatpush.xpose.msra.mxu2 %v133_v6  ;;  %1502 = vmatpush.xpose.msra.mxu3 %v133_v6  ;;  %s1457_s4 = sshll.u32 %s1734_s3, 4  ;;  %s1458_s4 = int_to_ptr.vmem [resolvable:$true] %s1457_s4 }
  0x1a   :  { %315 = vperm.xlu0 %1543, %v285_v10  }
  0x1b   :  { %147 = vmatpush.xpose.msra.mxu0 %v132_v8  ;;  %1503 = vmatpush.xpose.msra.mxu1 %v132_v8 }
  0x1c   :  { %1504 = vmatpush.xpose.msra.mxu2 %v132_v8  ;;  %1505 = vmatpush.xpose.msra.mxu3 %v132_v8  ;;  %v1732_v8 = vmov 0.0  }
  0x1d   :  { %321 = vperm.xlu2 %1545, %v287_v23   ;;  %318 = vperm.xlu1 %1544, %v286_v28  }
  0x1f   :  { %148 = vmatpush.xpose.msra.mxu0 %v131_v9  ;;  %1506 = vmatpush.xpose.msra.mxu1 %v131_v9 }
  0x20   :  { %1507 = vmatpush.xpose.msra.mxu2 %v131_v9  ;;  %1508 = vmatpush.xpose.msra.mxu3 %v131_v9 }
  0x22   :  { %324 = vperm.xlu0 %1543, %v288_v13  }
  0x23   :  { %149 = vmatpush.xpose.msra.mxu0 %v130_v11  ;;  %1509 = vmatpush.xpose.msra.mxu1 %v130_v11 }
  0x24   :  { %1510 = vmatpush.xpose.msra.mxu2 %v130_v11  ;;  %1511 = vmatpush.xpose.msra.mxu3 %v130_v11 }
  0x25   :  { %330 = vperm.xlu2 %1545, %v290_v27   ;;  %327 = vperm.xlu1 %1544, %v289_v35  }
  0x27   :  { %150 = vmatpush.xpose.msra.mxu0 %v129_v12  ;;  %1512 = vmatpush.xpose.msra.mxu1 %v129_v12 }
  0x28   :  { %1513 = vmatpush.xpose.msra.mxu2 %v129_v12  ;;  %1514 = vmatpush.xpose.msra.mxu3 %v129_v12  ;;  %v221_v12 = vadd.s32 96, %v1867_v51 }
  0x2a   :  { %333 = vperm.xlu0 %1543, %v291_v16   ;;  %vm259_vm15 = vcmp.eq.s32.totalorder %v221_v12, %v1869_v52 }
  0x2b   :  { %151 = vmatpush.xpose.msra.mxu0 %v128_v15  ;;  %1515 = vmatpush.xpose.msra.mxu1 %v128_v15 }
  0x2c   :  { %1516 = vmatpush.xpose.msra.mxu2 %v128_v15  ;;  %1517 = vmatpush.xpose.msra.mxu3 %v128_v15 }
  0x2d   :  { %339 = vperm.xlu2 %1545, %v293_v34   ;;  %336 = vperm.xlu1 %1544, %v292_v40  }
  0x2f   :  { %152 = vmatpush.xpose.msra.mxu0 %v127_v17  ;;  %1518 = vmatpush.xpose.msra.mxu1 %v127_v17 }
  0x30   :  { %1519 = vmatpush.xpose.msra.mxu2 %v127_v17  ;;  %1520 = vmatpush.xpose.msra.mxu3 %v127_v17 }
  0x32   :  { %342 = vperm.xlu0 %1543, %v294_v21  }
  0x33   :  { %153 = vmatpush.xpose.msra.mxu0 %v126_v20  ;;  %1521 = vmatpush.xpose.msra.mxu1 %v126_v20 }
  0x34   :  { %1522 = vmatpush.xpose.msra.mxu2 %v126_v20  ;;  %1523 = vmatpush.xpose.msra.mxu3 %v126_v20 }
  0x37   :  { %154 = vmatpush.xpose.msra.mxu0 %v125_v22  ;;  %1524 = vmatpush.xpose.msra.mxu1 %v125_v22 }
  0x38   :  { %1525 = vmatpush.xpose.msra.mxu2 %v125_v22  ;;  %1526 = vmatpush.xpose.msra.mxu3 %v125_v22 }
  0x3b   :  { %155 = vmatpush.xpose.msra.mxu0 %v124_v25  ;;  %1527 = vmatpush.xpose.msra.mxu1 %v124_v25 }
  0x3c   :  { %1528 = vmatpush.xpose.msra.mxu2 %v124_v25  ;;  %1529 = vmatpush.xpose.msra.mxu3 %v124_v25 }
  0x3f   :  { %156 = vmatpush.xpose.msra.mxu0 %v123_v26  ;;  %1530 = vmatpush.xpose.msra.mxu1 %v123_v26 }
  0x40   :  { %1531 = vmatpush.xpose.msra.mxu2 %v123_v26  ;;  %1532 = vmatpush.xpose.msra.mxu3 %v123_v26 }
  0x43   :  { %157 = vmatpush.xpose.msra.mxu0 %v122_v29  ;;  %1533 = vmatpush.xpose.msra.mxu1 %v122_v29 }
  0x44   :  { %1534 = vmatpush.xpose.msra.mxu2 %v122_v29  ;;  %1535 = vmatpush.xpose.msra.mxu3 %v122_v29 }
  0x46   :  { %158 = vmatmul.f32.vlgmr.msra.gmra.mxu0 %v106_v30  ;;  %170 = vmatmul.f32.vlgmr.msra.gmra.mxu1 %v110_v31  ;;  %v214_v30 = vadd.s32 40, %v1867_v51 }
  0x47   :  { %182 = vmatmul.f32.vlgmr.msra.gmra.mxu2 %v114_v32  ;;  %194 = vmatmul.f32.vlgmr.msra.gmra.mxu3 %v118_v33 }
  0x4e   :  { %161 = vmatmul.f32.gmra.mxu0 %v107_v36  ;;  %173 = vmatmul.f32.gmra.mxu1 %v111_v37 }
  0x4f   :  { %185 = vmatmul.f32.gmra.mxu2 %v115_v38  ;;  %197 = vmatmul.f32.gmra.mxu3 %v119_v39 }
  0x56   :  { %176 = vmatmul.f32.gmra.mxu1 %v112_v41  ;;  %164 = vmatmul.f32.gmra.mxu0 %v108_v42 }
  0x57   :  { %188 = vmatmul.f32.gmra.mxu2 %v116_v43  ;;  %200 = vmatmul.f32.gmra.mxu3 %v120_v44 }
  0x5e   :  { %167 = vmatmul.f32.gmra.mxu0 %v109_v45  ;;  %179 = vmatmul.f32.gmra.mxu1 %v113_v46 }
  0x5f   :  { %191 = vmatmul.f32.gmra.mxu2 %v117_v47  ;;  %203 = vmatmul.f32.gmra.mxu3 %v121_v48 }
  0x67   :  { %v310_v55 = vpop.permute.xlu2 %309 }
  0x68   :  { %vm349_vm7 = vcmp.eq.s32.totalorder %v310_v55, %v1890_v58 }
  0x6f   :  { %v1917_v4 = vpop.permute.xlu2 %312 }
  0x77   :  { %v322_v22 = vpop.permute.xlu2 %321 }
  0x7c   :  { %v298_v50 = vpop.permute.xlu0 %297 }
  0x7d   :  { %vm345_vm6 = vcmp.eq.s32.totalorder %v298_v50, %v1890_v58 }
  0x7f   :  { %v1945_v21 = vpop.permute.xlu1 %303 }
  0x84   :  { %v1892_v59 = vpop.permute.xlu0 %300 }
  0x87   :  { %v1972_v36 = vpop.permute.xlu1 %306 }
  0x8c   :  { %v1939_v18 = vpop.permute.xlu0 %315 }
  0x94   :  { %v1965_v32 = vpop.permute.xlu0 %324 }
  0x9c   :  { %v334_v53 = vpop.permute.xlu0 %333 }
  0xc3   :  { %v159_v62 = vpop.f32.mrf.mxu0  ;;  %v171_v63 = vpop.f32.mrf.mxu1 }
  0xc4   :  { %v160_v0 = vadd.f32 %v1885_v57, %v159_v62  ;;  %v172_v1 = vadd.f32 %v1885_v57, %v171_v63  ;;  %v2013_v63 = vpop.permute.xlu1 %318 }
  0xc6   :  { %v1919_v5 = vsel %vm247_vm2, -1e+09, %v160_v0  ;;  %v1921_v6 = vsel %vm251_vm3, -1e+09, %v172_v1  ;;  %vm353_vm3 = vcmp.eq.s32.totalorder %v322_v22, %v1890_v58  ;;  %v215_v22 = vadd.s32 48, %v1867_v51 }
  0xc7   :  { %441 = vmax.xlane.f32.xlu1 %v1919_v5  ;;  %vm365_vm8 = vcmp.gt.f32.partialorder %v1921_v6, -1e+08  ;;  %vm361_vm9 = vcmp.gt.f32.partialorder %v1919_v5, -1e+08 }
  0xc8   :  { %vm381_vm12 = vmand %vm349_vm7, %vm365_vm8  ;;  %vm248_vm7 = vcmp.eq.s32.totalorder %v210_v24, %v1869_v52  ;;  %vm252_vm8 = vcmp.eq.s32.totalorder %v214_v30, %v1869_v52 }
  0xc9   :  { %v1476_v9 = vsel %vm381_vm12, 1.0, %v1732_v8  ;;  %vm377_vm13 = vmand %vm345_vm6, %vm361_vm9  ;;  %vm346_vm12 = vcmp.eq.s32.totalorder %v1892_v59, %v1890_v58 }
  0xca   :  { %v183_v10 = vpop.f32.mrf.mxu2  ;;  %v195_v11 = vpop.f32.mrf.mxu3  ;;  %898 = vadd.xlane.f32.xlu0 %v1476_v9  ;;  %v1472_v13 = vsel %vm377_vm13, 1.0, %v1732_v8  ;;  %v798_v48 = vmul.f32 %v1476_v9, %v1921_v6 }
  0xcb   :  { %v184_v14 = vadd.f32 %v1885_v57, %v183_v10  ;;  %v162_v15 = vpop.f32.mrf.mxu0  ;;  %v174_v16 = vpop.f32.mrf.mxu1  ;;  %v794_v17 = vmul.f32 %v1472_v13, %v1919_v5  ;;  %v196_v20 = vadd.f32 %v1885_v57, %v195_v11 }
  0xcc   :  { %v163_v29 = vadd.f32 %v1885_v57, %v162_v15  ;;  %v175_v34 = vadd.f32 %v1885_v57, %v174_v16  ;;  %v328_v10 = vpop.permute.xlu1 %327 }
  0xcd   :  { %v1941_v19 = vsel %vm255_vm14, -1e+09, %v184_v14  ;;  %810 = vadd.xlane.f32.xlu2 %v794_v17  ;;  %v1950_v23 = vsel %vm259_vm15, -1e+09, %v196_v20  ;;  %vm350_vm14 = vcmp.eq.s32.totalorder %v1917_v4, %v1890_v58  ;;  %vm357_vm15 = vcmp.eq.s32.totalorder %v334_v53, %v1890_v58 }
  0xce   :  { %vm369_vm2 = vcmp.gt.f32.partialorder %v1941_v19, -1e+08  ;;  %v1967_v33 = vsel %vm248_vm7, -1e+09, %v163_v29  ;;  %v1977_v43 = vsel %vm252_vm8, -1e+09, %v175_v34 }
  0xcf   :  { %449 = vmax.xlane.f32.xlu1 %v1921_v6  ;;  %vm385_vm6 = vmand %vm353_vm3, %vm369_vm2  ;;  %vm362_vm9 = vcmp.gt.f32.partialorder %v1967_v33, -1e+08 }
  0xd0   :  { %v1480_v31 = vsel %vm385_vm6, 1.0, %v1732_v8  ;;  %vm378_vm13 = vmand %vm346_vm12, %vm362_vm9  ;;  %vm354_vm6 = vcmp.eq.s32.totalorder %v1965_v32, %v1890_v58  ;;  %vm253_vm12 = vcmp.eq.s32.totalorder %v215_v22, %v1869_v52 }
  0xd1   :  { %v802_v35 = vmul.f32 %v1480_v31, %v1941_v19  ;;  %v1473_v54 = vsel %vm378_vm13, 1.0, %v1732_v8 }
  0xd2   :  { %v186_v25 = vpop.f32.mrf.mxu2  ;;  %v1953_v26 = vpop.f32.mrf.mxu3  ;;  %465 = vmax.xlane.f32.xlu0 %v1950_v23  ;;  %v795_v9 = vmul.f32 %v1473_v54, %v1967_v33 }
  0xd3   :  { %v1956_v27 = vpop.f32.mrf.mxu1  ;;  %v1958_v28 = vpop.f32.mrf.mxu0  ;;  %v187_v60 = vadd.f32 %v1885_v57, %v186_v25  ;;  %v199_v12 = vadd.f32 %v1885_v57, %v1953_v26 }
  0xd4   :  { %v166_v15 = vadd.f32 %v1885_v57, %v1958_v28  ;;  %v337_v20 = vpop.permute.xlu1 %336  ;;  %v178_v24 = vadd.f32 %v1885_v57, %v1956_v27 }
  0xd5   :  { %457 = vmax.xlane.f32.xlu2 %v1941_v19  ;;  %vm358_vm8 = vcmp.eq.s32.totalorder %v337_v20, %v1890_v58 }
  0xd6   :  { %v2061_v26 = vsel %vm253_vm12, -1e+09, %v178_v24 }
  0xd7   :  { %890 = vadd.xlane.f32.xlu1 %v1472_v13  ;;  %v211_v13 = vadd.s32 16, %v1867_v51 }
  0xd9   :  { %vm249_vm2 = vcmp.eq.s32.totalorder %v211_v13, %v1869_v52 }
  0xda   :  { %v189_v37 = vpop.f32.mrf.mxu2  ;;  %v201_v38 = vpop.f32.mrf.mxu3  ;;  %826 = vadd.xlane.f32.xlu0 %v802_v35  ;;  %v2049_v17 = vsel %vm249_vm2, -1e+09, %v166_v15  ;;  %vm41_vm2 = vcmask 7168  }
  0xdb   :  { %v190_v39 = vadd.f32 %v1885_v57, %v189_v37  ;;  %v202_v40 = vadd.f32 %v1885_v57, %v201_v38  ;;  %v168_v41 = vpop.f32.mrf.mxu0  ;;  %v180_v42 = vpop.f32.mrf.mxu1  ;;  %58 = vst.msk [vmem:[#allocation3] sm:$0xff] %vm41_vm2, %v1732_v8 }
  0xdc   :  { %v169_v44 = vadd.f32 %v1885_v57, %v168_v41  ;;  %v181_v45 = vadd.f32 %v1885_v57, %v180_v42  ;;  %59 = vst.msk [vmem:[#allocation3 + $0x8] sm:$0xff] %vm41_vm2, %v1732_v8 }
  0xdd   :  { %v1986_v46 = vsel %vm257_vm1, -1e+09, %v190_v39  ;;  %v1991_v47 = vsel %vm261_vm0, -1e+09, %v202_v40  ;;  %443 = vmax.xlane.f32.xlu2 %v1967_v33  ;;  %vm366_vm1 = vcmp.gt.f32.partialorder %v1977_v43, -1e+08  ;;  %v343_v40 = vpop.permute.xlu0 %342 }
  0xde   :  { %v1998_v49 = vsel %vm250_vm10, -1e+09, %v169_v44  ;;  %v2003_v50 = vsel %vm254_vm11, -1e+09, %v181_v45  ;;  %vm373_vm0 = vcmp.gt.f32.partialorder %v1950_v23, -1e+08  ;;  %vm382_vm10 = vmand %vm350_vm14, %vm366_vm1  ;;  %vm347_vm1 = vcmp.eq.s32.totalorder %v1945_v21, %v1890_v58 }
  0xdf   :  { %818 = vadd.xlane.f32.xlu1 %v798_v48  ;;  %vm389_vm11 = vmand %vm357_vm15, %vm373_vm0  ;;  %v1477_v2 = vsel %vm382_vm10, 1.0, %v1732_v8  ;;  %vm363_vm0 = vcmp.gt.f32.partialorder %v2049_v17, -1e+08  ;;  %vm367_vm14 = vcmp.gt.f32.partialorder %v2061_v26, -1e+08  ;;  %vm351_vm10 = vcmp.eq.s32.totalorder %v1939_v18, %v1890_v58  ;;  %60 = vst.msk [vmem:[#allocation3 + $0x10] sm:$0xff] %vm41_vm2, %v1732_v8 }
  0xe0   :  { %v1484_v3 = vsel %vm389_vm11, 1.0, %v1732_v8  ;;  %v799_v4 = vmul.f32 %v1477_v2, %v1977_v43  ;;  %vm379_vm15 = vmand %vm347_vm1, %vm363_vm0  ;;  %vm368_vm12 = vcmp.gt.f32.partialorder %v2003_v50, -1e+08  ;;  %vm348_vm1 = vcmp.eq.s32.totalorder %v1972_v36, %v1890_v58  ;;  %61 = vst.msk [vmem:[#allocation3 + $0x18] sm:$0xff] %vm41_vm2, %v1732_v8 }
  0xe1   :  { %v806_v14 = vmul.f32 %v1484_v3, %v1950_v23  ;;  %vm383_vm11 = vmand %vm351_vm10, %vm367_vm14  ;;  %vm364_vm0 = vcmp.gt.f32.partialorder %v1998_v49, -1e+08  ;;  %62 = vst.msk [vmem:[#allocation3 + $0x20] sm:$0xff] %vm41_vm2, %v1732_v8 }
  0xe2   :  { %v192_v55 = vpop.f32.mrf.mxu2  ;;  %v204_v56 = vpop.f32.mrf.mxu3  ;;  %892 = vadd.xlane.f32.xlu0 %v1473_v54  ;;  %v1478_v27 = vsel %vm383_vm11, 1.0, %v1732_v8  ;;  %vm380_vm14 = vmand %vm348_vm1, %vm364_vm0  ;;  %63 = vst.msk [vmem:[#allocation3 + $0x28] sm:$0xff] %vm41_vm2, %v1732_v8 }
  0xe3   :  { %v193_v59 = vadd.f32 %v1885_v57, %v192_v55  ;;  %v205_v62 = vadd.f32 %v1885_v57, %v204_v56  ;;  %v1474_v57 = vsel %vm379_vm15, 1.0, %v1732_v8  ;;  %v800_v30 = vmul.f32 %v1478_v27, %v2061_v26  ;;  %64 = vst.msk [vmem:[#allocation3 + $0x30] sm:$0xff] %vm41_vm2, %v1732_v8 }
  0xe4   :  { %v796_v21 = vmul.f32 %v1474_v57, %v2049_v17  ;;  %65 = vst.msk [vmem:[#allocation3 + $0x38] sm:$0xff] %vm41_vm2, %v1732_v8  ;;  %v1475_v36 = vsel %vm380_vm14, 1.0, %v1732_v8 }
  0xe5   :  { %v2018_v0 = vsel %vm258_vm4, -1e+09, %v193_v59  ;;  %v2023_v1 = vsel %vm262_vm5, -1e+09, %v205_v62  ;;  %451 = vmax.xlane.f32.xlu2 %v1977_v43  ;;  %vm256_vm4 = vcmp.eq.s32.totalorder %v218_v7, %v1869_v52  ;;  %vm260_vm5 = vcmp.eq.s32.totalorder %v222_v61, %v1869_v52  ;;  %v2073_v52 = vpop.permute.xlu2 %330  ;;  %66 = vst.msk [vmem:[#allocation3 + $0x40] sm:$0xff] %vm41_vm2, %v1732_v8 }
  0xe6   :  { %v2034_v11 = vsel %vm256_vm4, -1e+09, %v187_v60  ;;  %v2044_v16 = vsel %vm260_vm5, -1e+09, %v199_v12  ;;  %vm355_vm4 = vcmp.eq.s32.totalorder %v328_v10, %v1890_v58  ;;  %vm371_vm5 = vcmp.gt.f32.partialorder %v1986_v46, -1e+08 }
  0xe7   :  { %914 = vadd.xlane.f32.xlu1 %v1484_v3  ;;  %vm370_vm3 = vcmp.gt.f32.partialorder %v2034_v11, -1e+08  ;;  %vm374_vm9 = vcmp.gt.f32.partialorder %v2044_v16, -1e+08  ;;  %vm372_vm15 = vcmp.gt.f32.partialorder %v2018_v0, -1e+08  ;;  %vm356_vm10 = vcmp.eq.s32.totalorder %v2073_v52, %v1890_v58 }
  0xe8   :  { %vm386_vm7 = vmand %vm354_vm6, %vm370_vm3  ;;  %vm375_vm6 = vcmp.gt.f32.partialorder %v1991_v47, -1e+08  ;;  %67 = vst.msk [vmem:[#allocation3 + $0x48] sm:$0xff] %vm41_vm2, %v1732_v8  ;;  %v797_v39 = vmul.f32 %v1475_v36, %v1998_v49 }
  0xe9   :  { %v1481_v25 = vsel %vm386_vm7, 1.0, %v1732_v8  ;;  %vm390_vm13 = vmand %vm358_vm8, %vm374_vm9  ;;  %vm352_vm9 = vcmp.eq.s32.totalorder %v2013_v63, %v1890_v58  ;;  %68 = vst.msk [vmem:[#allocation3 + $0x50] sm:$0xff] %vm41_vm2, %v1732_v8 }
  0xea   :  { %820 = vadd.xlane.f32.xlu0 %v799_v4  ;;  %v1485_v51 = vsel %vm390_vm13, 1.0, %v1732_v8  ;;  %v803_v28 = vmul.f32 %v1481_v25, %v2034_v11  ;;  %vm387_vm3 = vmand %vm355_vm4, %vm371_vm5  ;;  %69 = vst.msk [vmem:[#allocation3 + $0x58] sm:$0xff] %vm41_vm2, %v1732_v8  ;;  %vm376_vm4 = vcmp.gt.f32.partialorder %v2023_v1, -1e+08  ;;  %vm360_vm5 = vcmp.eq.s32.totalorder %v343_v40, %v1890_v58 }
  0xeb   :  { %v807_v29 = vmul.f32 %v1485_v51, %v2044_v16  ;;  %v1482_v32 = vsel %vm387_vm3, 1.0, %v1732_v8  ;;  %vm384_vm13 = vmand %vm352_vm9, %vm368_vm12  ;;  %70 = vst.msk [vmem:[#allocation3 + $0x60] sm:$0xff] %vm41_vm2, %v1732_v8 }
  0xec   :  { %v804_v37 = vmul.f32 %v1482_v32, %v1986_v46  ;;  %v1479_v38 = vsel %vm384_vm13, 1.0, %v1732_v8  ;;  %vm388_vm11 = vmand %vm356_vm10, %vm372_vm15  ;;  %71 = vst.msk [vmem:[#allocation3 + $0x68] sm:$0xff] %vm41_vm2, %v1732_v8 }
  0xed   :  { %906 = vadd.xlane.f32.xlu2 %v1480_v31  ;;  %v340_v18 = vpop.permute.xlu2 %339  ;;  %v1733_v31 = vmov -inf   ;;  %72 = vst.msk [vmem:[#allocation3 + $0x70] sm:$0xff] %vm41_vm2, %v1732_v8  ;;  %v801_v41 = vmul.f32 %v1479_v38, %v2003_v50  ;;  %v1483_v42 = vsel %vm388_vm11, 1.0, %v1732_v8  ;;  %vm392_vm3 = vmand %vm360_vm5, %vm376_vm4 }
  0xee   :  { %42 = vst.msk [vmem:[#allocation2] sm:$0xff] %vm41_vm2, %v1733_v31  ;;  %vm359_vm7 = vcmp.eq.s32.totalorder %v340_v18, %v1890_v58  ;;  %v805_v44 = vmul.f32 %v1483_v42, %v2018_v0  ;;  %v1487_v55 = vsel %vm392_vm3, 1.0, %v1732_v8 }
  0xef   :  { %812 = vadd.xlane.f32.xlu1 %v795_v9  ;;  %43 = vst.msk [vmem:[#allocation2 + $0x8] sm:$0xff] %vm41_vm2, %v1733_v31  ;;  %vm391_vm8 = vmand %vm359_vm7, %vm375_vm6 }
  0xf0   :  { %44 = vst.msk [vmem:[#allocation2 + $0x10] sm:$0xff] %vm41_vm2, %v1733_v31  ;;  %v1486_v34 = vsel %vm391_vm8, 1.0, %v1732_v8 }
  0xf1   :  { %45 = vst.msk [vmem:[#allocation2 + $0x18] sm:$0xff] %vm41_vm2, %v1733_v31  ;;  %v808_v35 = vmul.f32 %v1486_v34, %v1991_v47 }
  0xf2   :  { %459 = vmax.xlane.f32.xlu0 %v2034_v11  ;;  %46 = vst.msk [vmem:[#allocation2 + $0x20] sm:$0xff] %vm41_vm2, %v1733_v31 }
  0xf3   :  { %47 = vst.msk [vmem:[#allocation2 + $0x28] sm:$0xff] %vm41_vm2, %v1733_v31 }
  0xf4   :  { %48 = vst.msk [vmem:[#allocation2 + $0x30] sm:$0xff] %vm41_vm2, %v1733_v31 }
  0xf5   :  { %834 = vadd.xlane.f32.xlu2 %v806_v14  ;;  %49 = vst.msk [vmem:[#allocation2 + $0x38] sm:$0xff] %vm41_vm2, %v1733_v31  ;;  %v2159_v45 = vld [vmem:[#allocation2] sm:$0xff]  ;;  %v809_v14 = vmul.f32 %v1487_v55, %v2023_v1 }
  0xf6   :  { %50 = vst.msk [vmem:[#allocation2 + $0x40] sm:$0xff] %vm41_vm2, %v1733_v31  ;;  %v2239_v20 = vld [vmem:[#allocation2 + $0x8] sm:$0xff] }
  0xf7   :  { %467 = vmax.xlane.f32.xlu1 %v2044_v16  ;;  %51 = vst.msk [vmem:[#allocation2 + $0x48] sm:$0xff] %vm41_vm2, %v1733_v31 }
  0xf8   :  { %52 = vst.msk [vmem:[#allocation2 + $0x50] sm:$0xff] %vm41_vm2, %v1733_v31 }
  0xf9   :  { %53 = vst.msk [vmem:[#allocation2 + $0x58] sm:$0xff] %vm41_vm2, %v1733_v31  ;;  %v2188_v59 = vld [vmem:[#allocation2 + $0x20] sm:$0xff] }
  0xfa   :  { %445 = vmax.xlane.f32.xlu0 %v2049_v17  ;;  %54 = vst.msk [vmem:[#allocation2 + $0x60] sm:$0xff] %vm41_vm2, %v1733_v31  ;;  %v2262_v18 = vld [vmem:[#allocation2 + $0x28] sm:$0xff] }
  0xfb   :  { %55 = vst.msk [vmem:[#allocation2 + $0x68] sm:$0xff] %vm41_vm2, %v1733_v31 }
  0xfc   :  { %56 = vst.msk [vmem:[#allocation2 + $0x70] sm:$0xff] %vm41_vm2, %v1733_v31 }
  0xfd   :  { %900 = vadd.xlane.f32.xlu2 %v1477_v2  ;;  %57 = vst.msk [vmem:[#allocation2 + $0x78] sm:$0xff] %vm41_vm2, %v1733_v31  ;;  %v2212_v60 = vld [vmem:[#allocation2 + $0x40] sm:$0xff] }
  0xfe   :  { %73 = vst.msk [vmem:[#allocation3 + $0x78] sm:$0xff] %vm41_vm2, %v1732_v8 }
  0xff   :  { %908 = vadd.xlane.f32.xlu1 %v1481_v25  ;;  %74 = vst.msk [vmem:[#allocation4] sm:$0xff] %vm41_vm2, %v1732_v8 }
 0x100   :  { %75 = vst.msk [vmem:[#allocation4 + $0x8] sm:$0xff] %vm41_vm2, %v1732_v8 }
 0x101   :  { %76 = vst.msk [vmem:[#allocation4 + $0x10] sm:$0xff] %vm41_vm2, %v1732_v8  ;;  %v2199_v2 = vld [vmem:[#allocation2 + $0x60] sm:$0xff] }
 0x102   :  { %453 = vmax.xlane.f32.xlu0 %v2061_v26  ;;  %77 = vst.msk [vmem:[#allocation4 + $0x18] sm:$0xff] %vm41_vm2, %v1732_v8 }
 0x103   :  { %78 = vst.msk [vmem:[#allocation4 + $0x20] sm:$0xff] %vm41_vm2, %v1732_v8 }
 0x104   :  { %79 = vst.msk [vmem:[#allocation4 + $0x28] sm:$0xff] %vm41_vm2, %v1732_v8 }
 0x105   :  { %828 = vadd.xlane.f32.xlu2 %v803_v28  ;;  %80 = vst.msk [vmem:[#allocation4 + $0x30] sm:$0xff] %vm41_vm2, %v1732_v8 }
 0x106   :  { %81 = vst.msk [vmem:[#allocation4 + $0x38] sm:$0xff] %vm41_vm2, %v1732_v8  ;;  %v778_v24 = vld [vmem:[#allocation4] sm:$0xff] }
 0x107   :  { %836 = vadd.xlane.f32.xlu1 %v807_v29  ;;  %82 = vst.msk [vmem:[#allocation4 + $0x40] sm:$0xff] %vm41_vm2, %v1732_v8 }
 0x108   :  { %83 = vst.msk [vmem:[#allocation4 + $0x48] sm:$0xff] %vm41_vm2, %v1732_v8 }
 0x109   :  { %84 = vst.msk [vmem:[#allocation4 + $0x50] sm:$0xff] %vm41_vm2, %v1732_v8 }
 0x10a   :  { %916 = vadd.xlane.f32.xlu0 %v1485_v51  ;;  %85 = vst.msk [vmem:[#allocation4 + $0x58] sm:$0xff] %vm41_vm2, %v1732_v8 }
 0x10b   :  { %86 = vst.msk [vmem:[#allocation4 + $0x60] sm:$0xff] %vm41_vm2, %v1732_v8 }
 0x10c   :  { %87 = vst.msk [vmem:[#allocation4 + $0x68] sm:$0xff] %vm41_vm2, %v1732_v8 }
 0x10d   :  { %894 = vadd.xlane.f32.xlu2 %v1474_v57  ;;  %88 = vst.msk [vmem:[#allocation4 + $0x70] sm:$0xff] %vm41_vm2, %v1732_v8 }
 0x10e   :  { %89 = vst.msk [vmem:[#allocation4 + $0x78] sm:$0xff] %vm41_vm2, %v1732_v8 }
 0x10f   :  { %902 = vadd.xlane.f32.xlu1 %v1478_v27  ;;  %90 = vst.msk [vmem:[#allocation5] sm:$0xff] %vm41_vm2, %v1732_v8 }
 0x110   :  { %91 = vst.msk [vmem:[#allocation5 + $0x8] sm:$0xff] %vm41_vm2, %v1732_v8 }
 0x111   :  { %92 = vst.msk [vmem:[#allocation5 + $0x10] sm:$0xff] %vm41_vm2, %v1732_v8 }
 0x112   :  { %814 = vadd.xlane.f32.xlu0 %v796_v21  ;;  %93 = vst.msk [vmem:[#allocation5 + $0x18] sm:$0xff] %vm41_vm2, %v1732_v8 }
 0x113   :  { %94 = vst.msk [vmem:[#allocation5 + $0x20] sm:$0xff] %vm41_vm2, %v1732_v8 }
 0x114   :  { %95 = vst.msk [vmem:[#allocation5 + $0x28] sm:$0xff] %vm41_vm2, %v1732_v8 }
 0x115   :  { %822 = vadd.xlane.f32.xlu2 %v800_v30  ;;  %96 = vst.msk [vmem:[#allocation5 + $0x30] sm:$0xff] %vm41_vm2, %v1732_v8  ;;  %v786_v30 = vld [vmem:[#allocation4 + $0x40] sm:$0xff] }
 0x116   :  { %97 = vst.msk [vmem:[#allocation5 + $0x38] sm:$0xff] %vm41_vm2, %v1732_v8  ;;  %v874_v27 = vld [vmem:[#allocation5] sm:$0xff] }
 0x117   :  { %461 = vmax.xlane.f32.xlu1 %v1986_v46  ;;  %98 = vst.msk [vmem:[#allocation5 + $0x40] sm:$0xff] %vm41_vm2, %v1732_v8 }
 0x118   :  { %99 = vst.msk [vmem:[#allocation5 + $0x48] sm:$0xff] %vm41_vm2, %v1732_v8 }
 0x119   :  { %100 = vst.msk [vmem:[#allocation5 + $0x50] sm:$0xff] %vm41_vm2, %v1732_v8 }
 0x11a   :  { %910 = vadd.xlane.f32.xlu0 %v1482_v32  ;;  %101 = vst.msk [vmem:[#allocation5 + $0x58] sm:$0xff] %vm41_vm2, %v1732_v8  ;;  %v878_v51 = vld [vmem:[#allocation5 + $0x20] sm:$0xff] }
 0x11b   :  { %102 = vst.msk [vmem:[#allocation5 + $0x60] sm:$0xff] %vm41_vm2, %v1732_v8  ;;  %v782_v32 = vld [vmem:[#allocation4 + $0x20] sm:$0xff] }
 0x11c   :  { %103 = vst.msk [vmem:[#allocation5 + $0x68] sm:$0xff] %vm41_vm2, %v1732_v8 }
 0x11d   :  { %469 = vmax.xlane.f32.xlu2 %v1991_v47  ;;  %104 = vst.msk [vmem:[#allocation5 + $0x70] sm:$0xff] %vm41_vm2, %v1732_v8 }
 0x11e   :  { %105 = vst.msk [vmem:[#allocation5 + $0x78] sm:$0xff] %vm41_vm2, %v1732_v8 }
 0x11f   :  { %455 = vmax.xlane.f32.xlu1 %v2003_v50 }
 0x122   :  { %838 = vadd.xlane.f32.xlu0 %v808_v35  ;;  %v886_v40 = vld [vmem:[#allocation5 + $0x60] sm:$0xff] }
 0x125   :  { %447 = vmax.xlane.f32.xlu2 %v1998_v49 }
 0x127   :  { %830 = vadd.xlane.f32.xlu1 %v804_v37  ;;  %v875_v37 = vld [vmem:[#allocation5 + $0x8] sm:$0xff] }
 0x12a   :  { %904 = vadd.xlane.f32.xlu0 %v1479_v38 }
 0x12d   :  { %918 = vadd.xlane.f32.xlu2 %v1486_v34 }
 0x12f   :  { %896 = vadd.xlane.f32.xlu1 %v1475_v36 }
 0x132   :  { %471 = vmax.xlane.f32.xlu0 %v2023_v1 }
 0x135   :  { %816 = vadd.xlane.f32.xlu2 %v797_v39 }
 0x137   :  { %824 = vadd.xlane.f32.xlu1 %v801_v41 }
 0x13a   :  { %832 = vadd.xlane.f32.xlu0 %v805_v44  ;;  %v442_v48 = vpop.xlane.xlu1 %441 }
 0x13b   :  { %v2170_v53 = vmax.f32 %v2159_v45, %v442_v48 }
 0x13d   :  { %762 = vst.msk [vmem:[#allocation2] sm:$0xff] %vm41_vm2, %v2170_v53  ;;  %463 = vmax.xlane.f32.xlu2 %v2018_v0  ;;  %v899_v58 = vpop.xlane.xlu0 %898 }
 0x13e   :  { %v926_v29 = vadd.f32 %v899_v58, %v878_v51  ;;  %v882_v58 = vld [vmem:[#allocation5 + $0x40] sm:$0xff]  ;;  %v889_v51 = vld [vmem:[#allocation5 + $0x78] sm:$0xff] }
 0x13f   :  { %920 = vadd.xlane.f32.xlu1 %v1487_v55 }
 0x140   :  { %v811_v56 = vpop.xlane.xlu2 %810  ;;  %942 = vst.msk [vmem:[#allocation5 + $0x20] sm:$0xff] %vm41_vm2, %v926_v29  ;;  %v2302_v29 = vld [vmem:[#allocation2 + $0x68] sm:$0xff] }
 0x141   :  { %v842_v57 = vadd.f32 %v811_v56, %v778_v24  ;;  %v790_v24 = vld [vmem:[#allocation4 + $0x60] sm:$0xff] }
 0x142   :  { %v450_v62 = vpop.xlane.xlu1 %449 }
 0x143   :  { %v2197_v63 = vmax.f32 %v2188_v59, %v450_v62  ;;  %858 = vst.msk [vmem:[#allocation4] sm:$0xff] %vm41_vm2, %v842_v57  ;;  %v779_v62 = vld [vmem:[#allocation4 + $0x8] sm:$0xff] }
 0x145   :  { %912 = vadd.xlane.f32.xlu2 %v1483_v42  ;;  %v466_v4 = vpop.xlane.xlu0 %465  ;;  %766 = vst.msk [vmem:[#allocation2 + $0x20] sm:$0xff] %vm41_vm2, %v2197_v63  ;;  %v783_v42 = vld [vmem:[#allocation4 + $0x28] sm:$0xff] }
 0x146   :  { %v2210_v7 = vmax.f32 %v2199_v2, %v466_v4 }
 0x148   :  { %v458_v61 = vpop.xlane.xlu2 %457  ;;  %774 = vst.msk [vmem:[#allocation2 + $0x60] sm:$0xff] %vm41_vm2, %v2210_v7 }
 0x149   :  { %v2223_v10 = vmax.f32 %v2212_v60, %v458_v61 }
 0x14a   :  { %v891_v12 = vpop.xlane.xlu1 %890 }
 0x14b   :  { %v497_v13 = vsub.f32 %v2212_v60, %v2223_v10  ;;  %v922_v31 = vadd.f32 %v891_v12, %v874_v27  ;;  %770 = vst.msk [vmem:[#allocation2 + $0x40] sm:$0xff] %vm41_vm2, %v2223_v10  ;;  %v2979_v60 = vsub.f32 %v2199_v2, %v2210_v7  ;;  %v545_v2 = vld [vmem:[#allocation3 + $0x40] sm:$0xff] }
 0x14d   :  { %840 = vadd.xlane.f32.xlu2 %v809_v14  ;;  %v827_v15 = vpop.xlane.xlu0 %826  ;;  %938 = vst.msk [vmem:[#allocation5] sm:$0xff] %vm41_vm2, %v922_v31  ;;  %v2289_v14 = vld [vmem:[#allocation2 + $0x48] sm:$0xff]  ;;  %v2389_v31 = vld [vmem:[#allocation2 + $0x78] sm:$0xff] }
 0x14e   :  { %591 = vperm.xlu0 %1543, %v2197_v63   ;;  %v850_v35 = vadd.f32 %v827_v15, %v786_v30  ;;  %v2308_v30 = vld [vmem:[#allocation2 + $0x10] sm:$0xff] }
 0x150   :  { %v444_v22 = vpop.xlane.xlu2 %443  ;;  %866 = vst.msk [vmem:[#allocation4 + $0x40] sm:$0xff] %vm41_vm2, %v850_v35  ;;  %v879_v35 = vld [vmem:[#allocation5 + $0x28] sm:$0xff] }
 0x151   :  { %v2248_v25 = vmax.f32 %v2239_v20, %v444_v22 }
 0x152   :  { %v819_v28 = vpop.xlane.xlu1 %818 }
 0x153   :  { %v846_v36 = vadd.f32 %v819_v28, %v782_v32  ;;  %763 = vst.msk [vmem:[#allocation2 + $0x8] sm:$0xff] %vm41_vm2, %v2248_v25 }
 0x155   :  { %v893_v21 = vpop.xlane.xlu0 %892  ;;  %862 = vst.msk [vmem:[#allocation4 + $0x20] sm:$0xff] %vm41_vm2, %v846_v36  ;;  %v883_v36 = vld [vmem:[#allocation5 + $0x48] sm:$0xff] }
 0x156   :  { %v923_v41 = vadd.f32 %v893_v21, %v875_v37 }
 0x158   :  { %v452_v34 = vpop.xlane.xlu2 %451  ;;  %571 = vperm.xlu1 %1544, %v2170_v53   ;;  %939 = vst.msk [vmem:[#allocation5 + $0x8] sm:$0xff] %vm41_vm2, %v923_v41 }
 0x159   :  { %v2270_v38 = vmax.f32 %v2262_v18, %v452_v34 }
 0x15a   :  { %v915_v8 = vpop.xlane.xlu1 %914 }
 0x15b   :  { %v934_v48 = vadd.f32 %v915_v8, %v886_v40  ;;  %767 = vst.msk [vmem:[#allocation2 + $0x28] sm:$0xff] %vm41_vm2, %v2270_v38 }
 0x15d   :  { %v821_v44 = vpop.xlane.xlu0 %820  ;;  %950 = vst.msk [vmem:[#allocation5 + $0x60] sm:$0xff] %vm41_vm2, %v934_v48 }
 0x15e   :  { %v847_v55 = vadd.f32 %v821_v44, %v783_v42  ;;  %v2324_v44 = vld [vmem:[#allocation2 + $0x30] sm:$0xff] }
 0x160   :  { %v907_v56 = vpop.xlane.xlu2 %906  ;;  %631 = vperm.xlu1 %1544, %v2210_v7   ;;  %863 = vst.msk [vmem:[#allocation4 + $0x28] sm:$0xff] %vm41_vm2, %v847_v55  ;;  %v787_v55 = vld [vmem:[#allocation4 + $0x48] sm:$0xff] }
 0x161   :  { %v930_v4 = vadd.f32 %v907_v56, %v882_v58 }
 0x162   :  { %v813_v61 = vpop.xlane.xlu1 %812 }
 0x163   :  { %v843_v12 = vadd.f32 %v813_v61, %v779_v62  ;;  %946 = vst.msk [vmem:[#allocation5 + $0x40] sm:$0xff] %vm41_vm2, %v930_v4  ;;  %v791_v4 = vld [vmem:[#allocation4 + $0x68] sm:$0xff] }
 0x165   :  { %859 = vst.msk [vmem:[#allocation4 + $0x8] sm:$0xff] %vm41_vm2, %v843_v12  ;;  %611 = vperm.xlu2 %1545, %v2223_v10   ;;  %v460_v15 = vpop.xlane.xlu0 %459  ;;  %v529_v10 = vmul.f32 1.442695, %v2979_v60 }
 0x166   :  { %v2295_v22 = vmax.f32 %v2289_v14, %v460_v15 }
 0x168   :  { %771 = vst.msk [vmem:[#allocation2 + $0x48] sm:$0xff] %vm41_vm2, %v2295_v22  ;;  %v835_v28 = vpop.xlane.xlu2 %834  ;;  %616 = vperm.xlu1 %1544, %v2295_v22  }
 0x169   :  { %v854_v57 = vadd.f32 %v835_v28, %v790_v24  ;;  %v887_v24 = vld [vmem:[#allocation5 + $0x68] sm:$0xff] }
 0x16a   :  { %v468_v27 = vpop.xlane.xlu1 %467 }
 0x16b   :  { %870 = vst.msk [vmem:[#allocation4 + $0x60] sm:$0xff] %vm41_vm2, %v854_v57  ;;  %v2306_v21 = vmax.f32 %v2302_v29, %v468_v27  ;;  %v876_v27 = vld [vmem:[#allocation5 + $0x10] sm:$0xff] }
 0x16d   :  { %775 = vst.msk [vmem:[#allocation2 + $0x68] sm:$0xff] %vm41_vm2, %v2306_v21  ;;  %576 = vperm.xlu2 %1545, %v2248_v25   ;;  %v446_v32 = vpop.xlane.xlu0 %445  ;;  %636 = vperm.xlu0 %1543, %v2306_v21  }
 0x16e   :  { %v2317_v34 = vmax.f32 %v2308_v30, %v446_v32 }
 0x170   :  { %764 = vst.msk [vmem:[#allocation2 + $0x10] sm:$0xff] %vm41_vm2, %v2317_v34  ;;  %v901_v8 = vpop.xlane.xlu2 %900 }
 0x171   :  { %v927_v40 = vadd.f32 %v901_v8, %v879_v35  ;;  %v880_v35 = vld [vmem:[#allocation5 + $0x30] sm:$0xff] }
 0x172   :  { %v909_v41 = vpop.xlane.xlu1 %908 }
 0x173   :  { %943 = vst.msk [vmem:[#allocation5 + $0x28] sm:$0xff] %vm41_vm2, %v927_v40  ;;  %v931_v42 = vadd.f32 %v909_v41, %v883_v36  ;;  %v780_v41 = vld [vmem:[#allocation4 + $0x10] sm:$0xff] }
 0x175   :  { %947 = vst.msk [vmem:[#allocation5 + $0x48] sm:$0xff] %vm41_vm2, %v931_v42  ;;  %596 = vperm.xlu2 %1545, %v2270_v38   ;;  %v454_v48 = vpop.xlane.xlu0 %453  ;;  %581 = vperm.xlu0 %1543, %v2317_v34  }
 0x176   :  { %v2330_v58 = vmax.f32 %v2324_v44, %v454_v48 }
 0x178   :  { %768 = vst.msk [vmem:[#allocation2 + $0x30] sm:$0xff] %vm41_vm2, %v2330_v58  ;;  %v829_v62 = vpop.xlane.xlu2 %828  ;;  %601 = vperm.xlu1 %1544, %v2330_v58  }
 0x179   :  { %v851_v61 = vadd.f32 %v829_v62, %v787_v55  ;;  %v784_v55 = vld [vmem:[#allocation4 + $0x30] sm:$0xff] }
 0x17a   :  { %v837_v12 = vpop.xlane.xlu1 %836  ;;  %v2498_v60 = vld [vmem:[#allocation5 + $0x28] sm:$0xff] }
 0x17b   :  { %867 = vst.msk [vmem:[#allocation4 + $0x48] sm:$0xff] %vm41_vm2, %v851_v61  ;;  %v855_v15 = vadd.f32 %v837_v12, %v791_v4  ;;  %v2343_v4 = vld [vmem:[#allocation2 + $0x50] sm:$0xff] }
 0x17d   :  { %871 = vst.msk [vmem:[#allocation4 + $0x68] sm:$0xff] %vm41_vm2, %v855_v15  ;;  %v917_v28 = vpop.xlane.xlu0 %916 }
 0x17e   :  { %v935_v57 = vadd.f32 %v917_v28, %v887_v24  ;;  %v884_v24 = vld [vmem:[#allocation5 + $0x50] sm:$0xff] }
 0x17f   :  { %v888_v28 = vld [vmem:[#allocation5 + $0x70] sm:$0xff] }
 0x180   :  { %951 = vst.msk [vmem:[#allocation5 + $0x68] sm:$0xff] %vm41_vm2, %v935_v57  ;;  %v895_v32 = vpop.xlane.xlu2 %894 }
 0x181   :  { %v924_v8 = vadd.f32 %v895_v32, %v876_v27  ;;  %v2354_v32 = vld [vmem:[#allocation2 + $0x70] sm:$0xff] }
 0x182   :  { %v903_v36 = vpop.xlane.xlu1 %902 }
 0x183   :  { %940 = vst.msk [vmem:[#allocation5 + $0x10] sm:$0xff] %vm41_vm2, %v924_v8  ;;  %v928_v40 = vadd.f32 %v903_v36, %v880_v35  ;;  %v2357_v8 = vld [vmem:[#allocation2 + $0x38] sm:$0xff] }
 0x185   :  { %944 = vst.msk [vmem:[#allocation5 + $0x30] sm:$0xff] %vm41_vm2, %v928_v40  ;;  %v815_v42 = vpop.xlane.xlu0 %814 }
 0x186   :  { %v844_v48 = vadd.f32 %v815_v42, %v780_v41  ;;  %v877_v41 = vld [vmem:[#allocation5 + $0x18] sm:$0xff] }
 0x188   :  { %860 = vst.msk [vmem:[#allocation4 + $0x10] sm:$0xff] %vm41_vm2, %v844_v48  ;;  %v823_v62 = vpop.xlane.xlu2 %822  ;;  %v792_v48 = vld [vmem:[#allocation4 + $0x70] sm:$0xff] }
 0x189   :  { %v848_v61 = vadd.f32 %v823_v62, %v784_v55 }
 0x18a   :  { %v462_v12 = vpop.xlane.xlu1 %461 }
 0x18b   :  { %864 = vst.msk [vmem:[#allocation4 + $0x30] sm:$0xff] %vm41_vm2, %v848_v61  ;;  %v2347_v15 = vmax.f32 %v2343_v4, %v462_v12  ;;  %v2375_v12 = vld [vmem:[#allocation2 + $0x18] sm:$0xff] }
 0x18d   :  { %772 = vst.msk [vmem:[#allocation2 + $0x50] sm:$0xff] %vm41_vm2, %v2347_v15  ;;  %v911_v57 = vpop.xlane.xlu0 %910  ;;  %621 = vperm.xlu0 %1543, %v2347_v15  }
 0x18e   :  { %v932_v27 = vadd.f32 %v911_v57, %v884_v24  ;;  %v788_v57 = vld [vmem:[#allocation4 + $0x50] sm:$0xff] }
 0x190   :  { %948 = vst.msk [vmem:[#allocation5 + $0x50] sm:$0xff] %vm41_vm2, %v932_v27  ;;  %v470_v35 = vpop.xlane.xlu2 %469 }
 0x191   :  { %v2360_v36 = vmax.f32 %v2354_v32, %v470_v35 }
 0x192   :  { %v456_v40 = vpop.xlane.xlu1 %455 }
 0x193   :  { %776 = vst.msk [vmem:[#allocation2 + $0x70] sm:$0xff] %vm41_vm2, %v2360_v36  ;;  %v2367_v42 = vmax.f32 %v2357_v8, %v456_v40  ;;  %641 = vperm.xlu2 %1545, %v2360_v36  }
 0x195   :  { %769 = vst.msk [vmem:[#allocation2 + $0x38] sm:$0xff] %vm41_vm2, %v2367_v42  ;;  %v839_v62 = vpop.xlane.xlu0 %838  ;;  %606 = vperm.xlu0 %1543, %v2367_v42  }
 0x196   :  { %v856_v61 = vadd.f32 %v839_v62, %v792_v48  ;;  %v881_v48 = vld [vmem:[#allocation5 + $0x38] sm:$0xff] }
 0x198   :  { %872 = vst.msk [vmem:[#allocation4 + $0x70] sm:$0xff] %vm41_vm2, %v856_v61  ;;  %v448_v24 = vpop.xlane.xlu2 %447 }
 0x199   :  { %v2379_v27 = vmax.f32 %v2375_v12, %v448_v24 }
 0x19a   :  { %v831_v35 = vpop.xlane.xlu1 %830 }
 0x19b   :  { %765 = vst.msk [vmem:[#allocation2 + $0x18] sm:$0xff] %vm41_vm2, %v2379_v27  ;;  %v852_v55 = vadd.f32 %v831_v35, %v788_v57  ;;  %586 = vperm.xlu1 %1544, %v2379_v27  }
 0x19d   :  { %868 = vst.msk [vmem:[#allocation4 + $0x50] sm:$0xff] %vm41_vm2, %v852_v55  ;;  %v905_v62 = vpop.xlane.xlu0 %904  ;;  %v781_v55 = vld [vmem:[#allocation4 + $0x18] sm:$0xff] }
 0x19e   :  { %v929_v61 = vadd.f32 %v905_v62, %v881_v48  ;;  %v789_v62 = vld [vmem:[#allocation4 + $0x58] sm:$0xff] }
 0x1a0   :  { %945 = vst.msk [vmem:[#allocation5 + $0x38] sm:$0xff] %vm41_vm2, %v929_v61  ;;  %v919_v24 = vpop.xlane.xlu2 %918 }
 0x1a1   :  { %v936_v56 = vadd.f32 %v919_v24, %v888_v28 }
 0x1a2   :  { %v897_v37 = vpop.xlane.xlu1 %896 }
 0x1a3   :  { %952 = vst.msk [vmem:[#allocation5 + $0x70] sm:$0xff] %vm41_vm2, %v936_v56  ;;  %v925_v40 = vadd.f32 %v897_v37, %v877_v41  ;;  %v785_v56 = vld [vmem:[#allocation4 + $0x38] sm:$0xff] }
 0x1a5   :  { %941 = vst.msk [vmem:[#allocation5 + $0x18] sm:$0xff] %vm41_vm2, %v925_v40  ;;  %v472_v57 = vpop.xlane.xlu0 %471 }
 0x1a6   :  { %v2393_v35 = vmax.f32 %v2389_v31, %v472_v57  ;;  %v2402_v57 = vld [vmem:[#allocation2 + $0x58] sm:$0xff] }
 0x1a8   :  { %777 = vst.msk [vmem:[#allocation2 + $0x78] sm:$0xff] %vm41_vm2, %v2393_v35  ;;  %v817_v28 = vpop.xlane.xlu2 %816  ;;  %646 = vperm.xlu1 %1544, %v2393_v35  }
 0x1a9   :  { %v845_v37 = vadd.f32 %v817_v28, %v781_v55 }
 0x1aa   :  { %v825_v41 = vpop.xlane.xlu1 %824 }
 0x1ab   :  { %861 = vst.msk [vmem:[#allocation4 + $0x18] sm:$0xff] %vm41_vm2, %v845_v37  ;;  %v849_v40 = vadd.f32 %v825_v41, %v785_v56  ;;  %v885_v56 = vld [vmem:[#allocation5 + $0x58] sm:$0xff] }
 0x1ad   :  { %865 = vst.msk [vmem:[#allocation4 + $0x38] sm:$0xff] %vm41_vm2, %v849_v40  ;;  %v833_v61 = vpop.xlane.xlu0 %832  ;;  %v793_v40 = vld [vmem:[#allocation4 + $0x78] sm:$0xff] }
 0x1ae   :  { %v853_v24 = vadd.f32 %v833_v61, %v789_v62 }
 0x1b0   :  { %869 = vst.msk [vmem:[#allocation4 + $0x58] sm:$0xff] %vm41_vm2, %v853_v24  ;;  %v464_v48 = vpop.xlane.xlu2 %463 }
 0x1b1   :  { %v2406_v39 = vmax.f32 %v2402_v57, %v464_v48 }
 0x1b2   :  { %v921_v52 = vpop.xlane.xlu1 %920 }
 0x1b3   :  { %773 = vst.msk [vmem:[#allocation2 + $0x58] sm:$0xff] %vm41_vm2, %v2406_v39  ;;  %v937_v28 = vadd.f32 %v921_v52, %v889_v51  ;;  %626 = vperm.xlu2 %1545, %v2406_v39  }
 0x1b5   :  { %953 = vst.msk [vmem:[#allocation5 + $0x78] sm:$0xff] %vm41_vm2, %v937_v28 }
 0x1b8   :  { %v913_v37 = vpop.xlane.xlu2 %912 }
 0x1b9   :  { %v933_v41 = vadd.f32 %v913_v37, %v885_v56 }
 0x1bb   :  { %949 = vst.msk [vmem:[#allocation5 + $0x58] sm:$0xff] %vm41_vm2, %v933_v41 }
 0x1c0   :  { %v841_v48 = vpop.xlane.xlu2 %840  ;;  %v592_v55 = vpop.permute.xlu0 %591 }
 0x1c1   :  { %v857_v62 = vadd.f32 %v841_v48, %v793_v40  ;;  %v653_v28 = vsub.f32 %v1921_v6, %v592_v55 }
 0x1c3   :  { %873 = vst.msk [vmem:[#allocation4 + $0x78] sm:$0xff] %vm41_vm2, %v857_v62  ;;  %v673_v37 = vmul.f32 1.442695, %v653_v28 }
 0x1c8   :  { %v612_v61 = vpop.permute.xlu2 %611 }
 0x1c9   :  { %v657_v24 = vsub.f32 %v1941_v19, %v612_v61 }
 0x1ca   :  { %v572_v9 = vpop.permute.xlu1 %571 }
 0x1cb   :  { %v681_v52 = vmul.f32 1.442695, %v657_v24  ;;  %v649_v51 = vsub.f32 %v1919_v5, %v572_v9 }
 0x1cd   :  { %1548 = vpow2.f32 %v681_v52  ;;  %v665_v3 = vmul.f32 1.442695, %v649_v51 }
 0x1cf   :  { %1550 = vpow2.f32 %v665_v3 }
 0x1d0   :  { %v577_v56 = vpop.permute.xlu2 %576  ;;  %1552 = vpow2.f32 %v673_v37 }
 0x1d1   :  { %v650_v48 = vsub.f32 %v1967_v33, %v577_v56 }
 0x1d2   :  { %v632_v41 = vpop.permute.xlu1 %631 }
 0x1d3   :  { %v1549_v54 = vpop.eup %1548  ;;  %v661_v40 = vsub.f32 %v1950_v23, %v632_v41  ;;  %v667_v5 = vmul.f32 1.442695, %v650_v48 }
 0x1d4   :  { %713 = vadd.xlane.f32.xlu1 %v1549_v54 }
 0x1d5   :  { %v1551_v19 = vpop.eup %1550  ;;  %v689_v62 = vmul.f32 1.442695, %v661_v40 }
 0x1d6   :  { %697 = vadd.xlane.f32.xlu0 %v1551_v19  ;;  %v1553_v3 = vpop.eup %1552 }
 0x1d7   :  { %1554 = vpow2.f32 %v689_v62 }
 0x1d8   :  { %v597_v9 = vpop.permute.xlu2 %596  ;;  %1556 = vpow2.f32 %v667_v5 }
 0x1d9   :  { %v654_v6 = vsub.f32 %v1977_v43, %v597_v9 }
 0x1da   :  { %v617_v55 = vpop.permute.xlu1 %616 }
 0x1db   :  { %v675_v61 = vmul.f32 1.442695, %v654_v6  ;;  %v658_v24 = vsub.f32 %v2034_v11, %v617_v55 }
 0x1dc   :  { %705 = vadd.xlane.f32.xlu2 %v1553_v3 }
 0x1dd   :  { %v1555_v23 = vpop.eup %1554  ;;  %1558 = vpow2.f32 %v675_v61  ;;  %v683_v33 = vmul.f32 1.442695, %v658_v24 }
 0x1de   :  { %721 = vadd.xlane.f32.xlu0 %v1555_v23  ;;  %v1557_v51 = vpop.eup %1556 }
 0x1df   :  { %1560 = vpow2.f32 %v683_v33  ;;  %v637_v54 = vpop.permute.xlu0 %636 }
 0x1e0   :  { %v662_v52 = vsub.f32 %v2044_v16, %v637_v54 }
 0x1e2   :  { %v691_v28 = vmul.f32 1.442695, %v662_v52 }
 0x1e3   :  { %v1559_v56 = vpop.eup %1558 }
 0x1e4   :  { %1562 = vpow2.f32 %v691_v28  ;;  %699 = vadd.xlane.f32.xlu2 %v1557_v51  ;;  %707 = vadd.xlane.f32.xlu1 %v1559_v56 }
 0x1e5   :  { %v1561_v43 = vpop.eup %1560 }
 0x1e6   :  { %715 = vadd.xlane.f32.xlu0 %v1561_v43 }
 0x1e7   :  { %v582_v37 = vpop.permute.xlu0 %581 }
 0x1e8   :  { %v651_v11 = vsub.f32 %v2049_v17, %v582_v37 }
 0x1ea   :  { %v1563_v41 = vpop.eup %1562  ;;  %v669_v40 = vmul.f32 1.442695, %v651_v11  ;;  %v602_v48 = vpop.permute.xlu1 %601 }
 0x1eb   :  { %v655_v19 = vsub.f32 %v2061_v26, %v602_v48 }
 0x1ec   :  { %1564 = vpow2.f32 %v669_v40  ;;  %723 = vadd.xlane.f32.xlu2 %v1563_v41 }
 0x1ed   :  { %v677_v62 = vmul.f32 1.442695, %v655_v19  ;;  %v642_v16 = vpop.permute.xlu2 %641  ;;  %v521_v19 = vmul.f32 1.442695, %v497_v13  ;;  %v2455_v13 = vld [vmem:[#allocation5 + $0x60] sm:$0xff] }
 0x1ee   :  { %v663_v5 = vsub.f32 %v1991_v47, %v642_v16  ;;  %v2977_v16 = vsub.f32 %v2159_v45, %v2170_v53  ;;  %v2980_v45 = vsub.f32 %v2239_v20, %v2248_v25  ;;  %v2981_v20 = vsub.f32 %v2262_v18, %v2270_v38 }
 0x1ef   :  { %1566 = vpow2.f32 %v677_v62  ;;  %v2440_v62 = vld [vmem:[#allocation5] sm:$0xff] }
 0x1f0   :  { %v693_v9 = vmul.f32 1.442695, %v663_v5  ;;  %v505_v5 = vmul.f32 1.442695, %v2977_v16  ;;  %v507_v53 = vmul.f32 1.442695, %v2980_v45 }
 0x1f1   :  { %v515_v25 = vmul.f32 1.442695, %v2981_v20  ;;  %v542_v20 = vld [vmem:[#allocation3 + $0x28] sm:$0xff] }
 0x1f2   :  { %v1565_v6 = vpop.eup %1564  ;;  %1568 = vpow2.f32 %v693_v9  ;;  %v2978_v9 = vsub.f32 %v2188_v59, %v2197_v63  ;;  %v2466_v59 = vmax.f32 %v2455_v13, 1.0 }
 0x1f3   :  { %701 = vadd.xlane.f32.xlu1 %v1565_v6 }
 0x1f4   :  { %v513_v6 = vmul.f32 1.442695, %v2978_v9  ;;  %vm1302_vm0 = vweird.f32 %v2466_v59 }
 0x1f5   :  { %v1567_v55 = vpop.eup %1566 }
 0x1f6   :  { %709 = vadd.xlane.f32.xlu0 %v1567_v55  ;;  %v2461_v55 = vld [vmem:[#allocation5 + $0x8] sm:$0xff] }
 0x1f7   :  { %v2469_v7 = vmax.f32 %v2461_v55, 1.0 }
 0x1f8   :  { %v1569_v3 = vpop.eup %1568 }
 0x1f9   :  { %vm1137_vm14 = vweird.f32 %v2469_v7 }
 0x1fb   :  { %725 = vadd.xlane.f32.xlu1 %v1569_v3 }
 0x1ff   :  { %v622_v17 = vpop.permute.xlu0 %621 }
 0x200   :  { %v659_v61 = vsub.f32 %v1986_v46, %v622_v17 }
 0x202   :  { %v685_v24 = vmul.f32 1.442695, %v659_v61  ;;  %v2476_v61 = vld [vmem:[#allocation5 + $0x40] sm:$0xff] }
 0x204   :  { %1570 = vpow2.f32 %v685_v24 }
 0x207   :  { %v607_v26 = vpop.permute.xlu0 %606 }
 0x208   :  { %v656_v23 = vsub.f32 %v2003_v50, %v607_v26  ;;  %v537_v26 = vld [vmem:[#allocation3] sm:$0xff] }
 0x20a   :  { %v1571_v33 = vpop.eup %1570  ;;  %v679_v54 = vmul.f32 1.442695, %v656_v23 }
 0x20b   :  { %717 = vadd.xlane.f32.xlu2 %v1571_v33 }
 0x20c   :  { %1572 = vpow2.f32 %v679_v54 }
 0x20d   :  { %v627_v47 = vpop.permute.xlu2 %626  ;;  %v587_v52 = vpop.permute.xlu1 %586 }
 0x20e   :  { %v660_v51 = vsub.f32 %v2018_v0, %v627_v47  ;;  %v652_v28 = vsub.f32 %v1998_v49, %v587_v52  ;;  %v2432_v0 = vld [vmem:[#allocation5 + $0x20] sm:$0xff]  ;;  %v2482_v47 = vmax.f32 %v2476_v61, 1.0 }
 0x20f   :  { %v2435_v49 = vmax.f32 %v2432_v0, 1.0 }
 0x210   :  { %v687_v56 = vmul.f32 1.442695, %v660_v51  ;;  %v671_v43 = vmul.f32 1.442695, %v652_v28  ;;  %vm1242_vm4 = vweird.f32 %v2482_v47 }
 0x211   :  { %v1188_v16 = vand.u32 2147483648, %v2435_v49  ;;  %vm1182_vm6 = vweird.f32 %v2435_v49 }
 0x212   :  { %v1573_v37 = vpop.eup %1572  ;;  %1574 = vpow2.f32 %v687_v56 }
 0x213   :  { %1576 = vpow2.f32 %v671_v43  ;;  %711 = vadd.xlane.f32.xlu2 %v1573_v37  ;;  %v541_v43 = vld [vmem:[#allocation3 + $0x20] sm:$0xff] }
 0x214   :  { %v549_v37 = vld [vmem:[#allocation3 + $0x60] sm:$0xff] }
 0x218   :  { %v1575_v46 = vpop.eup %1574 }
 0x219   :  { %v1577_v11 = vpop.eup %1576  ;;  %719 = vadd.xlane.f32.xlu1 %v1575_v46  ;;  %v538_v46 = vld [vmem:[#allocation3 + $0x8] sm:$0xff] }
 0x21a   :  { %703 = vadd.xlane.f32.xlu0 %v1577_v11  ;;  %v647_v50 = vpop.permute.xlu1 %646 }
 0x21b   :  { %v664_v41 = vsub.f32 %v2023_v1, %v647_v50  ;;  %v2447_v1 = vmax.f32 %v2440_v62, 1.0 }
 0x21d   :  { %v695_v40 = vmul.f32 1.442695, %v664_v41  ;;  %v2982_v41 = vsub.f32 %v2289_v14, %v2295_v22  ;;  %v2983_v22 = vsub.f32 %v2302_v29, %v2306_v21  ;;  %v1128_v29 = vand.u32 2147483648, %v2447_v1 }
 0x21e   :  { %vm1122_vm9 = vweird.f32 %v2447_v1 }
 0x21f   :  { %1578 = vpow2.f32 %v695_v40  ;;  %v523_v40 = vmul.f32 1.442695, %v2982_v41 }
 0x220   :  { %1580 = vrcp.f32 %v2435_v49 }
 0x221   :  { %1582 = vpow2.f32 %v521_v19  ;;  %v1186_v19 = vand.u32 2147483647, %v2435_v49 }
 0x222   :  { %1584 = vpow2.f32 %v505_v5 }
 0x223   :  { %1586 = vrcp.f32 %v2447_v1  ;;  %vm2506_vm7 = vcmp.eq.f32.partialorder %v1186_v19, 8.507059e+37 }
 0x224   :  { %1588 = vpow2.f32 %v513_v6 }
 0x225   :  { %v1579_v48 = vpop.eup %1578  ;;  %1590 = vpow2.f32 %v529_v10  ;;  %v531_v10 = vmul.f32 1.442695, %v2983_v22 }
 0x226   :  { %727 = vadd.xlane.f32.xlu0 %v1579_v48  ;;  %v2463_v3 = vpop.eup %1580  ;;  %1592 = vpow2.f32 %v507_v53 }
 0x227   :  { %v1583_v63 = vpop.eup %1582  ;;  %v1178_v17 = vmul.f32 %v2463_v3, %v2435_v49  ;;  %1594 = vrcp.f32 %v2466_v59  ;;  %vm1183_vm8 = vweird.f32 %v2463_v3 }
 0x228   :  { %v1585_v24 = vpop.eup %1584  ;;  %v561_v33 = vmul.f32 %v1583_v63, %v545_v2  ;;  %1596 = vrcp.f32 %v2469_v7  ;;  %vm2538_vm12 = vmor %vm1182_vm6, %vm1183_vm8 }
 0x229   :  { %v2478_v23 = vpop.eup %1586  ;;  %1598 = vpow2.f32 %v515_v25  ;;  %v553_v52 = vmul.f32 %v1585_v24, %v537_v26  ;;  %v1179_v51 = vsub.f32 1.0, %v1178_v17  ;;  %v1189_v17 = vor.u32 1.1754944e-38, %v1188_v16  ;;  %v2510_v24 = vld [vmem:[#allocation5 + $0x48] sm:$0xff] }
 0x22a   :  { %v1589_v18 = vpop.eup %1588  ;;  %v1118_v11 = vmul.f32 %v2478_v23, %v2447_v1  ;;  %1600 = vrcp.f32 %v2482_v47  ;;  %v1141_v16 = vand.u32 2147483647, %v2469_v7  ;;  %vm1123_vm1 = vweird.f32 %v2478_v23 }
 0x22b   :  { %v1591_v28 = vpop.eup %1590  ;;  %v557_v9 = vmul.f32 %v1589_v18, %v541_v43  ;;  %v1180_v6 = vmul.f32 %v2463_v3, %v1179_v51  ;;  %1602 = vpow2.f32 %v523_v40  ;;  %v2532_v40 = vor.u32 1.1754944e-38, %v1128_v29  ;;  %vm2576_vm15 = vmor %vm1122_vm9, %vm1123_vm1 }
 0x22c   :  { %v1593_v50 = vpop.eup %1592  ;;  %v565_v45 = vmul.f32 %v1591_v28, %v549_v37  ;;  %v1119_v63 = vsub.f32 1.0, %v1118_v11  ;;  %1604 = vpow2.f32 %v531_v10  ;;  %vm2606_vm3 = vcmp.eq.f32.partialorder %v1141_v16, 8.507059e+37 }
 0x22d   :  { %v2494_v5 = vpop.eup %1594  ;;  %v554_v53 = vmul.f32 %v1593_v50, %v538_v46  ;;  %v2527_v46 = vmax.f32 %v2510_v24, 1.0  ;;  %v1308_v50 = vand.u32 2147483648, %v2466_v59 }
 0x22e   :  { %v2500_v14 = vpop.eup %1596  ;;  %v1298_v21 = vmul.f32 %v2494_v5, %v2466_v59  ;;  %v1120_v43 = vmul.f32 %v2478_v23, %v1119_v63  ;;  %v2990_v63 = vsub.f32 %v2308_v30, %v2317_v34  ;;  %vm1303_vm10 = vweird.f32 %v2494_v5 }
 0x22f   :  { %v1599_v2 = vpop.eup %1598  ;;  %vm1138_vm5 = vweird.f32 %v2500_v14  ;;  %vm2628_vm6 = vmor %vm1302_vm0, %vm1303_vm10  ;;  %vm1257_vm1 = vweird.f32 %v2527_v46 }
 0x230   :  { %v2523_v51 = vpop.eup %1600  ;;  %v1299_v19 = vsub.f32 1.0, %v1298_v21  ;;  %vm2647_vm9 = vmor %vm1137_vm14, %vm1138_vm5 }
 0x231   :  { %v1238_v10 = vmul.f32 %v2523_v51, %v2482_v47 }
 0x247   :  { %v714_v54 = vpop.xlane.xlu1 %713 }
 0x248   :  { %v737_v38 = vadd.f32 %v714_v54, %v561_v33  ;;  %v1126_v33 = vand.u32 2147483647, %v2447_v1  ;;  %v2517_v54 = vmax.f32 %v2498_v60, 1.0  ;;  %v1246_v1 = vand.u32 2147483647, %v2482_v47 }
 0x249   :  { %v698_v56 = vpop.xlane.xlu0 %697 }
 0x24a   :  { %754 = vst.msk [vmem:[#allocation3 + $0x40] sm:$0xff] %vm41_vm2, %v737_v38  ;;  %v729_v48 = vadd.f32 %v698_v56, %v553_v52  ;;  %v1181_v38 = vadd.f32 %v2463_v3, %v1180_v6  ;;  %v1133_v52 = vmul.f32 %v2500_v14, %v2469_v7  ;;  %v558_v56 = vmul.f32 %v1599_v2, %v542_v20  ;;  %v546_v6 = vld [vmem:[#allocation3 + $0x48] sm:$0xff] }
 0x24b   :  { %vm2545_vm13 = vcmp.eq.f32.partialorder %v1126_v33, 8.507059e+37  ;;  %v509_v2 = vmul.f32 1.442695, %v2990_v63  ;;  %v1121_v20 = vadd.f32 %v2478_v23, %v1120_v43  ;;  %v2562_v33 = vor.u32 1.1754944e-38, %v1308_v50 }
 0x24c   :  { %746 = vst.msk [vmem:[#allocation3] sm:$0xff] %vm41_vm2, %v729_v48  ;;  %v1185_v49 = vsel %vm2538_vm12, %v2463_v3, %v1181_v38  ;;  %v1143_v3 = vand.u32 2147483648, %v2469_v7  ;;  %v1300_v38 = vmul.f32 %v2494_v5, %v1299_v19  ;;  %v1239_v50 = vsub.f32 1.0, %v1238_v10  ;;  %v2588_v48 = vld [vmem:[#allocation5 + $0x10] sm:$0xff] }
 0x24d   :  { %vm2639_vm8 = vcmp.eq.f32.partialorder %v1246_v1, 8.507059e+37 }
 0x24f   :  { %v706_v26 = vpop.xlane.xlu2 %705 }
 0x250   :  { %v733_v18 = vadd.f32 %v706_v26, %v557_v9  ;;  %v1603_v9 = vpop.eup %1602  ;;  %v1306_v26 = vand.u32 2147483647, %v2466_v59 }
 0x251   :  { %v722_v28 = vpop.xlane.xlu0 %721  ;;  %v981_v37 = vld [vmem:[#allocation3 + $0x40] sm:$0xff]  ;;  %v1605_v29 = vpop.eup %1604  ;;  %v562_v34 = vmul.f32 %v1603_v9, %v546_v6  ;;  %v2993_v9 = vsub.f32 %v2324_v44, %v2330_v58 }
 0x252   :  { %750 = vst.msk [vmem:[#allocation3 + $0x20] sm:$0xff] %vm41_vm2, %v733_v18  ;;  %v741_v11 = vadd.f32 %v722_v28, %v565_v45  ;;  %1606 = vlog2.f32 %v981_v37  ;;  %v1134_v45 = vsub.f32 1.0, %v1133_v52  ;;  %v2568_v18 = vsel %vm2506_vm7, %v1189_v17, %v1185_v49 }
 0x253   :  { %v973_v41 = vld [vmem:[#allocation3] sm:$0xff]  ;;  %1608 = vrcp.f32 %v2517_v54  ;;  %v1248_v52 = vand.u32 2147483648, %v2482_v47  ;;  %v517_v6 = vmul.f32 1.442695, %v2993_v9  ;;  %vm2598_vm11 = vcmp.eq.f32.partialorder %v1306_v26, 8.507059e+37 }
 0x254   :  { %758 = vst.msk [vmem:[#allocation3 + $0x60] sm:$0xff] %vm41_vm2, %v741_v11  ;;  %1610 = vlog2.f32 %v973_v41  ;;  %v1135_v25 = vmul.f32 %v2500_v14, %v1134_v45  ;;  %vm1243_vm7 = vweird.f32 %v2523_v51  ;;  %v1069_v9 = vld [vmem:[#allocation4] sm:$0xff] }
 0x255   :  { %1612 = vrcp.f32 %v2527_v46  ;;  %v2603_v44 = vor.u32 1.1754944e-38, %v1248_v52  ;;  %v2998_v52 = vsub.f32 %v2354_v32, %v2360_v36  ;;  %v1144_v36 = vor.u32 1.1754944e-38, %v1143_v3  ;;  %vm2667_vm12 = vmor %vm1242_vm4, %vm1243_vm7 }
 0x256   :  { %1614 = vpow2.f32 %v509_v2  ;;  %v1136_v26 = vadd.f32 %v2500_v14, %v1135_v25 }
 0x257   :  { %v700_v21 = vpop.xlane.xlu2 %699  ;;  %v708_v30 = vpop.xlane.xlu1 %707 }
 0x258   :  { %v1607_v28 = vpop.eup %1606  ;;  %v730_v43 = vadd.f32 %v700_v21, %v554_v53  ;;  %v734_v37 = vadd.f32 %v708_v30, %v558_v56  ;;  %v1125_v53 = vsel %vm2576_vm15, %v2478_v23, %v1121_v20  ;;  %v550_v23 = vld [vmem:[#allocation3 + $0x68] sm:$0xff]  ;;  %v1301_v20 = vadd.f32 %v2494_v5, %v1300_v38  ;;  %v957_v30 = vld [vmem:[#allocation2] sm:$0xff] }
 0x259   :  { %v2581_v17 = vpop.eup %1608  ;;  %v716_v41 = vpop.xlane.xlu0 %715  ;;  %v977_v56 = vld [vmem:[#allocation3 + $0x20] sm:$0xff]  ;;  %v1006_v10 = vmul.f32 0.6931472, %v1607_v28  ;;  %v2614_v38 = vmax.f32 %v2588_v48, 1.0  ;;  %v533_v28 = vmul.f32 1.442695, %v2998_v52  ;;  %v1130_v16 = vsel %vm2545_vm13, %v2532_v40, %v1125_v53 }
 0x25a   :  { %v1611_v19 = vpop.eup %1610  ;;  %747 = vst.msk [vmem:[#allocation3 + $0x8] sm:$0xff] %vm41_vm2, %v730_v43  ;;  %v738_v49 = vadd.f32 %v716_v41, %v562_v34  ;;  %1616 = vlog2.f32 %v977_v56  ;;  %v1240_v34 = vmul.f32 %v2523_v51, %v1239_v50  ;;  %v1193_v11 = vmul.f32 %v2581_v17, %v2517_v54  ;;  %v539_v56 = vld [vmem:[#allocation3 + $0x10] sm:$0xff] }
 0x25b   :  { %v2594_v45 = vpop.eup %1612  ;;  %751 = vst.msk [vmem:[#allocation3 + $0x28] sm:$0xff] %vm41_vm2, %v734_v37  ;;  %v990_v63 = vmul.f32 0.6931472, %v1611_v19  ;;  %v985_v2 = vld [vmem:[#allocation3 + $0x60] sm:$0xff]  ;;  %v566_v41 = vmul.f32 %v1605_v29, %v550_v23  ;;  %v1305_v29 = vsel %vm2628_vm6, %v2494_v5, %v1301_v20  ;;  %v1140_v5 = vsel %vm2647_vm9, %v2500_v14, %v1136_v26  ;;  %v543_v50 = vld [vmem:[#allocation3 + $0x30] sm:$0xff] }
 0x25c   :  { %755 = vst.msk [vmem:[#allocation3 + $0x48] sm:$0xff] %vm41_vm2, %v738_v49  ;;  %1618 = vlog2.f32 %v985_v2  ;;  %v965_v37 = vld [vmem:[#allocation2 + $0x40] sm:$0xff]  ;;  %v1253_v25 = vmul.f32 %v2594_v45, %v2527_v46  ;;  %v1615_v22 = vpop.eup %1614  ;;  %v1194_v7 = vsub.f32 1.0, %v1193_v11  ;;  %v1310_v11 = vsel %vm2598_vm11, %v2562_v33, %v1305_v29 }
 0x25d   :  { %v1021_v43 = vadd.f32 %v990_v63, %v957_v30  ;;  %v1029_v32 = vadd.f32 %v1006_v10, %v965_v37  ;;  %1620 = vpow2.f32 %v517_v6  ;;  %v1241_v6 = vadd.f32 %v2523_v51, %v1240_v34  ;;  %v961_v2 = vld [vmem:[#allocation2 + $0x20] sm:$0xff] }
 0x25e   :  { %1622 = vrcp.f32 %v2614_v38  ;;  %v555_v63 = vmul.f32 %v1615_v22, %v539_v56  ;;  %v1254_v30 = vsub.f32 1.0, %v1253_v25  ;;  %v969_v37 = vld [vmem:[#allocation2 + $0x60] sm:$0xff]  ;;  %vm1197_vm13 = vweird.f32 %v2517_v54 }
 0x25f   :  { %v724_v40 = vpop.xlane.xlu2 %723  ;;  %v1085_v53 = vmul.f32 %v2440_v62, %v1021_v43  ;;  %1624 = vpow2.f32 %v533_v28  ;;  %v1093_v20 = vmul.f32 %v2476_v61, %v1029_v32  ;;  %v2658_v28 = vld [vmem:[#allocation5 + $0x30] sm:$0xff]  ;;  %v1245_v47 = vsel %vm2667_vm12, %v2523_v51, %v1241_v6  ;;  %v1077_v22 = vld [vmem:[#allocation4 + $0x40] sm:$0xff] }
 0x260   :  { %v1617_v62 = vpop.eup %1616  ;;  %v742_v19 = vadd.f32 %v724_v40, %v566_v41  ;;  %v1195_v32 = vmul.f32 %v2581_v17, %v1194_v7  ;;  %v1255_v40 = vmul.f32 %v2594_v45, %v1254_v30  ;;  %v1081_v6 = vld [vmem:[#allocation4 + $0x60] sm:$0xff]  ;;  %vm1258_vm0 = vweird.f32 %v2594_v45  ;;  %v958_v30 = vld [vmem:[#allocation2 + $0x8] sm:$0xff] }
 0x261   :  { %v1101_v1 = vsub.f32 %v1069_v9, %v1085_v53  ;;  %v998_v49 = vmul.f32 0.6931472, %v1617_v62  ;;  %v974_v10 = vld [vmem:[#allocation3 + $0x8] sm:$0xff]  ;;  %v1261_v53 = vand.u32 2147483647, %v2527_v46  ;;  %v1109_v62 = vsub.f32 %v1077_v22, %v1093_v20  ;;  %v551_v20 = vld [vmem:[#allocation3 + $0x70] sm:$0xff]  ;;  %vm2718_vm10 = vmor %vm1257_vm1, %vm1258_vm0 }
 0x262   :  { %v1619_v23 = vpop.eup %1618  ;;  %759 = vst.msk [vmem:[#allocation3 + $0x68] sm:$0xff] %vm41_vm2, %v742_v19  ;;  %1626 = vlog2.f32 %v974_v10  ;;  %v978_v34 = vld [vmem:[#allocation3 + $0x28] sm:$0xff]  ;;  %vm1198_vm14 = vweird.f32 %v2581_v17 }
 0x263   :  { %v1131_v52 = vmul.f32 %v1130_v16, %v1101_v1  ;;  %v1025_v43 = vadd.f32 %v998_v49, %v961_v2  ;;  %v1014_v14 = vmul.f32 0.6931472, %v1619_v23  ;;  %v982_v26 = vld [vmem:[#allocation3 + $0x48] sm:$0xff]  ;;  %1628 = vlog2.f32 %v978_v34  ;;  %v1621_v41 = vpop.eup %1620  ;;  %vm2706_vm15 = vmor %vm1197_vm13, %vm1198_vm14 }
 0x264   :  { %v2673_v16 = vsel %vm2606_vm3, %v1144_v36, %v1140_v5  ;;  %1630 = vlog2.f32 %v982_v26  ;;  %v2681_v25 = vpop.eup %1622  ;;  %v1073_v36 = vld [vmem:[#allocation4 + $0x20] sm:$0xff]  ;;  %v559_v9 = vmul.f32 %v1621_v41, %v543_v50  ;;  %v1250_v5 = vsel %vm2639_vm8, %v2603_v44, %v1245_v47  ;;  %v962_v26 = vld [vmem:[#allocation2 + $0x28] sm:$0xff]  ;;  %v2761_v41 = vld [vmem:[#allocation5 + $0x38] sm:$0xff] }
 0x265   :  { %1359 = vperm.xlu0 %1543, %v1131_v52   ;;  %v1089_v33 = vmul.f32 %v2432_v0, %v1025_v43  ;;  %v1033_v21 = vadd.f32 %v1014_v14, %v969_v37  ;;  %v2687_v0 = vmax.f32 %v2658_v28, 1.0  ;;  %v1625_v56 = vpop.eup %1624  ;;  %v1196_v23 = vadd.f32 %v2581_v17, %v1195_v32  ;;  %v1070_v22 = vld [vmem:[#allocation4 + $0x8] sm:$0xff] }
 0x266   :  { %v702_v58 = vpop.xlane.xlu1 %701  ;;  %v1256_v44 = vadd.f32 %v2594_v45, %v1255_v40  ;;  %v1251_v52 = vmul.f32 %v1250_v5, %v1109_v62  ;;  %v1263_v37 = vand.u32 2147483648, %v2527_v46  ;;  %v1148_v50 = vmul.f32 %v2681_v25, %v2614_v38 }
 0x267   :  { %v731_v29 = vadd.f32 %v702_v58, %v555_v63  ;;  %v1105_v3 = vsub.f32 %v1073_v36, %v1089_v33  ;;  %v1097_v51 = vmul.f32 %v2455_v13, %v1033_v21  ;;  %1632 = vrcp.f32 %v2687_v0 }
 0x268   :  { %v1627_v19 = vpop.eup %1626  ;;  %v567_v33 = vmul.f32 %v1625_v56, %v551_v20  ;;  %v1201_v58 = vand.u32 2147483647, %v2517_v54  ;;  %v1260_v40 = vsel %vm2718_vm10, %v2594_v45, %v1256_v44  ;;  %vm2726_vm11 = vcmp.eq.f32.partialorder %v1261_v53, 8.507059e+37  ;;  %v1078_v53 = vld [vmem:[#allocation4 + $0x48] sm:$0xff] }
 0x269   :  { %v1629_v1 = vpop.eup %1628  ;;  %748 = vst.msk [vmem:[#allocation3 + $0x10] sm:$0xff] %vm41_vm2, %v731_v29  ;;  %v710_v49 = vpop.xlane.xlu0 %709  ;;  %v1191_v10 = vmul.f32 %v2568_v18, %v1105_v3  ;;  %v1113_v7 = vsub.f32 %v1081_v6, %v1097_v51  ;;  %v992_v13 = vmul.f32 0.6931472, %v1627_v19  ;;  %v966_v18 = vld [vmem:[#allocation2 + $0x48] sm:$0xff]  ;;  %v1200_v46 = vsel %vm2706_vm15, %v2581_v17, %v1196_v23 }
 0x26a   :  { %v1631_v63 = vpop.eup %1630  ;;  %v735_v2 = vadd.f32 %v710_v49, %v559_v9  ;;  %v1000_v59 = vmul.f32 0.6931472, %v1629_v1  ;;  %v3013_v29 = vsub.f32 %v2343_v4, %v2347_v15  ;;  %v1074_v19 = vld [vmem:[#allocation4 + $0x28] sm:$0xff]  ;;  %v1264_v9 = vor.u32 1.1754944e-38, %v1263_v37 }
 0x26b   :  { %1379 = vperm.xlu2 %1545, %v1191_v10   ;;  %v1311_v34 = vmul.f32 %v1310_v11, %v1113_v7  ;;  %v1022_v43 = vadd.f32 %v992_v13, %v958_v30  ;;  %v1008_v14 = vmul.f32 0.6931472, %v1631_v63  ;;  %v1203_v11 = vand.u32 2147483648, %v2517_v54  ;;  %v2744_v13 = vld [vmem:[#allocation5 + $0x50] sm:$0xff] }
 0x26c   :  { %752 = vst.msk [vmem:[#allocation3 + $0x30] sm:$0xff] %vm41_vm2, %v735_v2  ;;  %v1026_v61 = vadd.f32 %v1000_v59, %v962_v26  ;;  %v525_v54 = vmul.f32 1.442695, %v3013_v29  ;;  %v1149_v1 = vsub.f32 1.0, %v1148_v50  ;;  %vm1202_vm4 = vcmp.eq.f32.partialorder %v1201_v58, 8.507059e+37 }
 0x26d   :  { %1419 = vperm.xlu1 %1544, %v1311_v34   ;;  %1399 = vperm.xlu0 %1543, %v1251_v52   ;;  %v1086_v21 = vmul.f32 %v2461_v55, %v1022_v43  ;;  %v1030_v47 = vadd.f32 %v1008_v14, %v966_v18  ;;  %v2738_v45 = vpop.eup %1632  ;;  %v1204_v5 = vor.u32 1.1754944e-38, %v1203_v11  ;;  %v1265_v4 = vsel %vm2726_vm11, %v1264_v9, %v1260_v40  ;;  %v959_v43 = vld [vmem:[#allocation2 + $0x10] sm:$0xff]  ;;  %v2797_v9 = vld [vmem:[#allocation5 + $0x18] sm:$0xff] }
 0x26e   :  { %v726_v36 = vpop.xlane.xlu1 %725  ;;  %v1090_v55 = vmul.f32 %v2498_v60, %v1026_v61  ;;  %v1150_v23 = vmul.f32 %v2681_v25, %v1149_v1  ;;  %v2750_v63 = vmax.f32 %v2744_v13, 1.0  ;;  %vm1153_vm5 = vweird.f32 %v2681_v25  ;;  %v547_v18 = vld [vmem:[#allocation3 + $0x50] sm:$0xff] }
 0x26f   :  { %v743_v3 = vadd.f32 %v726_v36, %v567_v33  ;;  %v1102_v51 = vsub.f32 %v1070_v22, %v1086_v21  ;;  %v1094_v62 = vmul.f32 %v2510_v24, %v1030_v47  ;;  %v1205_v15 = vsel %vm1202_vm4, %v1204_v5, %v1200_v46  ;;  %v963_v33 = vld [vmem:[#allocation2 + $0x30] sm:$0xff] }
 0x270   :  { %v1106_v6 = vsub.f32 %v1074_v19, %v1090_v55  ;;  %v975_v60 = vld [vmem:[#allocation3 + $0x10] sm:$0xff]  ;;  %v3014_v20 = vsub.f32 %v2357_v8, %v2367_v42  ;;  %v1151_v59 = vadd.f32 %v2681_v25, %v1150_v23  ;;  %v1158_v14 = vand.u32 2147483648, %v2614_v38 }
 0x271   :  { %760 = vst.msk [vmem:[#allocation3 + $0x70] sm:$0xff] %vm41_vm2, %v743_v3  ;;  %v1146_v17 = vmul.f32 %v2673_v16, %v1102_v51  ;;  %v1110_v49 = vsub.f32 %v1078_v53, %v1094_v62  ;;  %1634 = vlog2.f32 %v975_v60  ;;  %v1208_v16 = vmul.f32 %v2738_v45, %v2687_v0  ;;  %v1071_v47 = vld [vmem:[#allocation4 + $0x10] sm:$0xff] }
 0x272   :  { %1636 = vpow2.f32 %v525_v54  ;;  %v1206_v10 = vmul.f32 %v1205_v15, %v1106_v6  ;;  %v519_v30 = vmul.f32 1.442695, %v3014_v20  ;;  %vm1152_vm3 = vweird.f32 %v2614_v38  ;;  %v1075_v19 = vld [vmem:[#allocation4 + $0x30] sm:$0xff] }
 0x273   :  { %1364 = vperm.xlu2 %1545, %v1146_v17   ;;  %v1266_v24 = vmul.f32 %v1265_v4, %v1110_v49  ;;  %v979_v7 = vld [vmem:[#allocation3 + $0x30] sm:$0xff]  ;;  %v1209_v34 = vsub.f32 1.0, %v1208_v16  ;;  %v1156_v61 = vand.u32 2147483647, %v2614_v38  ;;  %vm2765_vm6 = vmor %vm1152_vm3, %vm1153_vm5  ;;  %v1159_v32 = vor.u32 1.1754944e-38, %v1158_v14  ;;  %v548_v16 = vld [vmem:[#allocation3 + $0x58] sm:$0xff] }
 0x274   :  { %1638 = vlog2.f32 %v979_v7  ;;  %v1155_v50 = vsel %vm2765_vm6, %v2681_v25, %v1151_v59  ;;  %v2775_v36 = vmax.f32 %v2761_v41, 1.0  ;;  %v3017_v22 = vsub.f32 %v2402_v57, %v2406_v39  ;;  %v2788_v39 = vld [vmem:[#allocation5 + $0x68] sm:$0xff] }
 0x275   :  { %1404 = vperm.xlu1 %1544, %v1266_v24   ;;  %1384 = vperm.xlu0 %1543, %v1206_v10   ;;  %1640 = vrcp.f32 %v2750_v63  ;;  %v1210_v38 = vmul.f32 %v2738_v45, %v1209_v34  ;;  %vm1157_vm7 = vcmp.eq.f32.partialorder %v1156_v61, 8.507059e+37  ;;  %v3018_v25 = vsub.f32 %v2375_v12, %v2379_v27  ;;  %v544_v27 = vld [vmem:[#allocation3 + $0x38] sm:$0xff] }
 0x276   :  { %1642 = vpow2.f32 %v519_v30  ;;  %v527_v40 = vmul.f32 1.442695, %v3017_v22  ;;  %v1160_v29 = vsel %vm1157_vm7, %v1159_v32, %v1155_v50  ;;  %vm1213_vm8 = vweird.f32 %v2738_v45  ;;  %v967_v22 = vld [vmem:[#allocation2 + $0x50] sm:$0xff] }
 0x277   :  { %v1635_v2 = vpop.eup %1634  ;;  %v511_v55 = vmul.f32 1.442695, %v3018_v25  ;;  %v1211_v62 = vadd.f32 %v2738_v45, %v1210_v38  ;;  %v1218_v57 = vand.u32 2147483648, %v2687_v0  ;;  %1644 = vrcp.f32 %v2775_v36 }
 0x278   :  { %v994_v44 = vmul.f32 0.6931472, %v1635_v2  ;;  %v1637_v52 = vpop.eup %1636  ;;  %1646 = vpow2.f32 %v527_v40  ;;  %vm1212_vm9 = vweird.f32 %v2687_v0  ;;  %v2800_v6 = vmax.f32 %v2788_v39, 1.0 }
 0x279   :  { %v563_v21 = vmul.f32 %v1637_v52, %v547_v18  ;;  %1648 = vpow2.f32 %v511_v55  ;;  %vm1214_vm12 = vmor %vm1212_vm9, %vm1213_vm8  ;;  %v1219_v17 = vor.u32 1.1754944e-38, %v1218_v57  ;;  %v3019_v30 = vsub.f32 %v2389_v31, %v2393_v35  ;;  %v986_v18 = vld [vmem:[#allocation3 + $0x68] sm:$0xff]  ;;  %v2847_v55 = vld [vmem:[#allocation5 + $0x70] sm:$0xff] }
 0x27a   :  { %v1639_v26 = vpop.eup %1638  ;;  %v1023_v37 = vadd.f32 %v994_v44, %v959_v43  ;;  %v1215_v60 = vsel %vm1214_vm12, %v2738_v45, %v1211_v62  ;;  %1650 = vrcp.f32 %v2800_v6  ;;  %v540_v45 = vld [vmem:[#allocation3 + $0x18] sm:$0xff]  ;;  %vm1272_vm0 = vweird.f32 %v2750_v63 }
 0x27b   :  { %v1002_v42 = vmul.f32 0.6931472, %v1639_v26  ;;  %v2783_v54 = vpop.eup %1640  ;;  %v535_v44 = vmul.f32 1.442695, %v3019_v30  ;;  %v2817_v43 = vld [vmem:[#allocation5 + $0x58] sm:$0xff]  ;;  %vm1227_vm11 = vweird.f32 %v2775_v36  ;;  %vm1317_vm5 = vweird.f32 %v2800_v6 }
 0x27c   :  { %v1087_v11 = vmul.f32 %v2588_v48, %v1023_v37  ;;  %v1643_v12 = vpop.eup %1642  ;;  %v1268_v53 = vmul.f32 %v2783_v54, %v2750_v63  ;;  %v2822_v35 = vmax.f32 %v2817_v43, 1.0  ;;  %vm1273_vm1 = vweird.f32 %v2783_v54 }
 0x27d   :  { %v1027_v58 = vadd.f32 %v1002_v42, %v963_v33  ;;  %v560_v1 = vmul.f32 %v1643_v12, %v544_v27  ;;  %v2806_v4 = vpop.eup %1644  ;;  %v2824_v42 = vld [vmem:[#allocation5 + $0x78] sm:$0xff]  ;;  %v1276_v40 = vand.u32 2147483647, %v2750_v63  ;;  %vm2842_vm14 = vmor %vm1272_vm0, %vm1273_vm1  ;;  %v1079_v27 = vld [vmem:[#allocation4 + $0x50] sm:$0xff] }
 0x27e   :  { %v718_v56 = vpop.xlane.xlu2 %717  ;;  %v1103_v48 = vsub.f32 %v1071_v47, %v1087_v11  ;;  %v1269_v10 = vsub.f32 1.0, %v1268_v53  ;;  %v1647_v7 = vpop.eup %1646  ;;  %v1223_v52 = vmul.f32 %v2806_v4, %v2775_v36  ;;  %v1278_v47 = vand.u32 2147483648, %v2750_v63 }
 0x27f   :  { %v739_v46 = vadd.f32 %v718_v56, %v563_v21  ;;  %v1091_v51 = vmul.f32 %v2658_v28, %v1027_v58  ;;  %v1216_v28 = vand.u32 2147483647, %v2687_v0  ;;  %v2804_v0 = vmax.f32 %v2797_v9, 1.0  ;;  %v1649_v20 = vpop.eup %1648 }
 0x280   :  { %v1161_v3 = vmul.f32 %v1160_v29, %v1103_v48  ;;  %v564_v59 = vmul.f32 %v1647_v7, %v548_v16  ;;  %v1270_v34 = vmul.f32 %v2783_v54, %v1269_v10  ;;  %v556_v14 = vmul.f32 %v1649_v20, %v540_v45  ;;  %v2819_v37 = vpop.eup %1650 }
 0x281   :  { %756 = vst.msk [vmem:[#allocation3 + $0x50] sm:$0xff] %vm41_vm2, %v739_v46  ;;  %v1107_v5 = vsub.f32 %v1075_v19, %v1091_v51  ;;  %vm1217_vm13 = vcmp.eq.f32.partialorder %v1216_v28, 8.507059e+37  ;;  %v1224_v33 = vsub.f32 1.0, %v1223_v52  ;;  %v1313_v58 = vmul.f32 %v2819_v37, %v2800_v6  ;;  %v552_v51 = vld [vmem:[#allocation3 + $0x78] sm:$0xff] }
 0x282   :  { %1369 = vperm.xlu1 %1544, %v1161_v3   ;;  %v1220_v24 = vsel %vm1217_vm13, %v1219_v17, %v1215_v60  ;;  %v1271_v50 = vadd.f32 %v2783_v54, %v1270_v34  ;;  %v2838_v56 = vmax.f32 %v2824_v42, 1.0  ;;  %v1279_v57 = vor.u32 1.1754944e-38, %v1278_v47 }
 0x283   :  { %v1221_v23 = vmul.f32 %v1220_v24, %v1107_v5  ;;  %v1225_v63 = vmul.f32 %v2806_v4, %v1224_v33  ;;  %vm1277_vm15 = vcmp.eq.f32.partialorder %v1276_v40, 8.507059e+37  ;;  %v1314_v28 = vsub.f32 1.0, %v1313_v58  ;;  %v1076_v33 = vld [vmem:[#allocation4 + $0x38] sm:$0xff] }
 0x284   :  { %v1275_v46 = vsel %vm2842_vm14, %v2783_v54, %v1271_v50  ;;  %v2858_v19 = vmax.f32 %v2847_v55, 1.0  ;;  %vm1228_vm10 = vweird.f32 %v2806_v4  ;;  %v1233_v5 = vand.u32 2147483648, %v2775_v36 }
 0x285   :  { %v1280_v53 = vsel %vm1277_vm15, %v1279_v57, %v1275_v46  ;;  %v1231_v20 = vand.u32 2147483647, %v2775_v36  ;;  %v1315_v45 = vmul.f32 %v2819_v37, %v1314_v28  ;;  %vm2871_vm4 = vmor %vm1227_vm11, %vm1228_vm10  ;;  %vm1318_vm7 = vweird.f32 %v2819_v37  ;;  %v968_v28 = vld [vmem:[#allocation2 + $0x58] sm:$0xff] }
 0x286   :  { %v712_v49 = vpop.xlane.xlu2 %711  ;;  %v1171_v57 = vand.u32 2147483647, %v2804_v0  ;;  %vm2904_vm8 = vmor %vm1317_vm5, %vm1318_vm7  ;;  %vm1287_vm0 = vweird.f32 %v2822_v35  ;;  %vm1347_vm11 = vweird.f32 %v2838_v56 }
 0x287   :  { %v736_v15 = vadd.f32 %v712_v49, %v560_v1  ;;  %vm1232_vm3 = vcmp.eq.f32.partialorder %v1231_v20, 8.507059e+37 }
 0x288   :  { %v983_v2 = vld [vmem:[#allocation3 + $0x50] sm:$0xff]  ;;  %vm1172_vm13 = vcmp.eq.f32.partialorder %v1171_v57, 8.507059e+37 }
 0x289   :  { %753 = vst.msk [vmem:[#allocation3 + $0x38] sm:$0xff] %vm41_vm2, %v736_v15  ;;  %1652 = vlog2.f32 %v983_v2  ;;  %v964_v2 = vld [vmem:[#allocation2 + $0x38] sm:$0xff] }
 0x28a   :  { %1389 = vperm.xlu1 %1544, %v1221_v23   ;;  %1654 = vrcp.f32 %v2804_v0 }
 0x28b   :  { %1656 = vpow2.f32 %v535_v44 }
 0x28c   :  { %v720_v26 = vpop.xlane.xlu1 %719  ;;  %1658 = vlog2.f32 %v986_v18  ;;  %v987_v18 = vld [vmem:[#allocation3 + $0x70] sm:$0xff] }
 0x28d   :  { %v704_v61 = vpop.xlane.xlu0 %703  ;;  %v740_v8 = vadd.f32 %v720_v26, %v564_v59  ;;  %v1293_v59 = vand.u32 2147483648, %v2822_v35 }
 0x28e   :  { %v732_v31 = vadd.f32 %v704_v61, %v556_v14  ;;  %v970_v14 = vld [vmem:[#allocation2 + $0x68] sm:$0xff] }
 0x28f   :  { %v1653_v11 = vpop.eup %1652  ;;  %757 = vst.msk [vmem:[#allocation3 + $0x58] sm:$0xff] %vm41_vm2, %v740_v8  ;;  %v1234_v8 = vor.u32 1.1754944e-38, %v1233_v5 }
 0x290   :  { %v2829_v38 = vpop.eup %1654  ;;  %749 = vst.msk [vmem:[#allocation3 + $0x18] sm:$0xff] %vm41_vm2, %v732_v31  ;;  %v1010_v21 = vmul.f32 0.6931472, %v1653_v11  ;;  %v980_v32 = vld [vmem:[#allocation3 + $0x38] sm:$0xff]  ;;  %v1323_v11 = vand.u32 2147483648, %v2800_v6 }
 0x291   :  { %1660 = vlog2.f32 %v980_v32  ;;  %v1163_v29 = vmul.f32 %v2829_v38, %v2804_v0  ;;  %v1657_v3 = vpop.eup %1656  ;;  %vm1168_vm6 = vweird.f32 %v2829_v38 }
 0x292   :  { %v1031_v48 = vadd.f32 %v1010_v21, %v967_v22  ;;  %1662 = vrcp.f32 %v2822_v35  ;;  %v1659_v12 = vpop.eup %1658  ;;  %v568_v17 = vmul.f32 %v1657_v3, %v552_v51  ;;  %v1321_v51 = vand.u32 2147483647, %v2800_v6 }
 0x293   :  { %1664 = vrcp.f32 %v2838_v56  ;;  %v1164_v15 = vsub.f32 1.0, %v1163_v29  ;;  %v1016_v23 = vmul.f32 0.6931472, %v1659_v12  ;;  %v1173_v29 = vand.u32 2147483648, %v2804_v0 }
 0x294   :  { %v1095_v62 = vmul.f32 %v2744_v13, %v1031_v48  ;;  %v1226_v13 = vadd.f32 %v2806_v4, %v1225_v63  ;;  %v960_v63 = vld [vmem:[#allocation2 + $0x18] sm:$0xff]  ;;  %vm1322_vm12 = vcmp.eq.f32.partialorder %v1321_v51, 8.507059e+37 }
 0x295   :  { %v1165_v36 = vmul.f32 %v2829_v38, %v1164_v15  ;;  %v1034_v31 = vadd.f32 %v1016_v23, %v970_v14  ;;  %v1072_v15 = vld [vmem:[#allocation4 + $0x18] sm:$0xff] }
 0x296   :  { %v1111_v54 = vsub.f32 %v1079_v27, %v1095_v62  ;;  %v984_v60 = vld [vmem:[#allocation3 + $0x58] sm:$0xff]  ;;  %v1230_v52 = vsel %vm2871_vm4, %v2806_v4, %v1226_v13  ;;  %v1316_v4 = vadd.f32 %v2819_v37, %v1315_v45 }
 0x297   :  { %v1661_v1 = vpop.eup %1660  ;;  %v976_v49 = vld [vmem:[#allocation3 + $0x18] sm:$0xff]  ;;  %1666 = vlog2.f32 %v984_v60  ;;  %v1235_v32 = vsel %vm1232_vm3, %v1234_v8, %v1230_v52  ;;  %v1166_v40 = vadd.f32 %v2829_v38, %v1165_v36  ;;  %v1098_v3 = vmul.f32 %v2788_v39, %v1034_v31  ;;  %v1082_v60 = vld [vmem:[#allocation4 + $0x68] sm:$0xff] }
 0x298   :  { %v2863_v24 = vpop.eup %1662  ;;  %v1281_v10 = vmul.f32 %v1280_v53, %v1111_v54  ;;  %v1004_v7 = vmul.f32 0.6931472, %v1661_v1  ;;  %1668 = vlog2.f32 %v976_v49  ;;  %v1320_v27 = vsel %vm2904_vm8, %v2819_v37, %v1316_v4  ;;  %v1080_v14 = vld [vmem:[#allocation4 + $0x58] sm:$0xff] }
 0x299   :  { %v728_v16 = vpop.xlane.xlu0 %727  ;;  %1670 = vrcp.f32 %v2858_v19  ;;  %v2875_v34 = vpop.eup %1664  ;;  %v1283_v26 = vmul.f32 %v2863_v24, %v2822_v35  ;;  %v1174_v37 = vor.u32 1.1754944e-38, %v1173_v29  ;;  %vm1288_vm1 = vweird.f32 %v2863_v24 }
 0x29a   :  { %v744_v30 = vadd.f32 %v728_v16, %v568_v17  ;;  %1409 = vperm.xlu2 %1545, %v1281_v10   ;;  %v1028_v44 = vadd.f32 %v1004_v7, %v964_v2  ;;  %v1343_v58 = vmul.f32 %v2875_v34, %v2838_v56  ;;  %1672 = vlog2.f32 %v987_v18  ;;  %vm2933_vm14 = vmor %vm1287_vm0, %vm1288_vm1  ;;  %v971_v18 = vld [vmem:[#allocation2 + $0x70] sm:$0xff] }
 0x29b   :  { %v1284_v25 = vsub.f32 1.0, %v1283_v26  ;;  %v1114_v10 = vsub.f32 %v1082_v60, %v1098_v3  ;;  %v1291_v52 = vand.u32 2147483647, %v2822_v35  ;;  %vm1348_vm15 = vweird.f32 %v2875_v34 }
 0x29c   :  { %761 = vst.msk [vmem:[#allocation3 + $0x78] sm:$0xff] %vm41_vm2, %v744_v30  ;;  %v1092_v61 = vmul.f32 %v2761_v41, %v1028_v44  ;;  %vm1167_vm2 = vweird.f32 %v2804_v0  ;;  %v1324_v0 = vor.u32 1.1754944e-38, %v1323_v11  ;;  %v1344_v54 = vsub.f32 1.0, %v1343_v58  ;;  %vm2948_vm4 = vmor %vm1347_vm11, %vm1348_vm15 }
 0x29d   :  { %v1667_v50 = vpop.eup %1666  ;;  %vm2910_vm9 = vmor %vm1167_vm2, %vm1168_vm6  ;;  %v1285_v17 = vmul.f32 %v2863_v24, %v1284_v25  ;;  %v1353_v4 = vand.u32 2147483648, %v2838_v56  ;;  %vm1292_vm10 = vcmp.eq.f32.partialorder %v1291_v52, 8.507059e+37  ;;  %v1084_v25 = vld [vmem:[#allocation4 + $0x78] sm:$0xff]  ;;  %vm1332_vm6 = vweird.f32 %v2858_v19 }
 0x29e   :  { %v1669_v21 = vpop.eup %1668  ;;  %v1108_v47 = vsub.f32 %v1076_v33, %v1092_v61  ;;  %v1012_v48 = vmul.f32 0.6931472, %v1667_v50  ;;  %v1170_v5 = vsel %vm2910_vm9, %v2829_v38, %v1166_v40  ;;  %v1325_v23 = vsel %vm1322_vm12, %v1324_v0, %v1320_v27  ;;  %v972_v33 = vld [vmem:[#allocation2 + $0x78] sm:$0xff] }
 0x29f   :  { %v2892_v41 = vpop.eup %1670  ;;  %v996_v22 = vmul.f32 0.6931472, %v1669_v21  ;;  %v1175_v16 = vsel %vm1172_vm13, %v1174_v37, %v1170_v5  ;;  %v1286_v45 = vadd.f32 %v2863_v24, %v1285_v17  ;;  %v1326_v44 = vmul.f32 %v1325_v23, %v1114_v10 }
 0x2a0   :  { %v1236_v46 = vmul.f32 %v1235_v32, %v1108_v47  ;;  %v1328_v6 = vmul.f32 %v2892_v41, %v2858_v19  ;;  %v1032_v1 = vadd.f32 %v1012_v48, %v968_v28  ;;  %v1673_v49 = vpop.eup %1672  ;;  %v1294_v50 = vor.u32 1.1754944e-38, %v1293_v59 }
 0x2a1   :  { %v1024_v62 = vadd.f32 %v996_v22, %v960_v63  ;;  %v1018_v30 = vmul.f32 0.6931472, %v1673_v49  ;;  %v1290_v35 = vsel %vm2933_vm14, %v2863_v24, %v1286_v45  ;;  %v1351_v47 = vand.u32 2147483647, %v2838_v56 }
 0x2a2   :  { %1394 = vperm.xlu2 %1545, %v1236_v46   ;;  %v1329_v38 = vsub.f32 1.0, %v1328_v6  ;;  %v1096_v20 = vmul.f32 %v2817_v43, %v1032_v1  ;;  %v1295_v32 = vsel %vm1292_vm10, %v1294_v50, %v1290_v35  ;;  %vm1333_vm5 = vweird.f32 %v2892_v41 }
 0x2a3   :  { %v1088_v53 = vmul.f32 %v2797_v9, %v1024_v62  ;;  %v988_v13 = vld [vmem:[#allocation3 + $0x78] sm:$0xff]  ;;  %v1345_v9 = vmul.f32 %v2875_v34, %v1344_v54  ;;  %v1035_v11 = vadd.f32 %v1018_v30, %v971_v18  ;;  %v1354_v46 = vor.u32 1.1754944e-38, %v1353_v4  ;;  %v1083_v62 = vld [vmem:[#allocation4 + $0x70] sm:$0xff]  ;;  %vm1334_vm7 = vmor %vm1332_vm6, %vm1333_vm5 }
 0x2a4   :  { %1674 = vlog2.f32 %v988_v13  ;;  %v1330_v61 = vmul.f32 %v2892_v41, %v1329_v38  ;;  %v1112_v8 = vsub.f32 %v1080_v14, %v1096_v20  ;;  %v1338_v63 = vand.u32 2147483648, %v2858_v19 }
 0x2a5   :  { %v1104_v7 = vsub.f32 %v1072_v15, %v1088_v53  ;;  %v1346_v43 = vadd.f32 %v2875_v34, %v1345_v9  ;;  %v1099_v56 = vmul.f32 %v2847_v55, %v1035_v11  ;;  %vm1352_vm3 = vcmp.eq.f32.partialorder %v1351_v47, 8.507059e+37 }
 0x2a6   :  { %v1331_v24 = vadd.f32 %v2892_v41, %v1330_v61  ;;  %v1296_v22 = vmul.f32 %v1295_v32, %v1112_v8  ;;  %v1336_v3 = vand.u32 2147483647, %v2858_v19  ;;  %v1339_v57 = vor.u32 1.1754944e-38, %v1338_v63 }
 0x2a7   :  { %v1176_v2 = vmul.f32 %v1175_v16, %v1104_v7  ;;  %v1350_v48 = vsel %vm2948_vm4, %v2875_v34, %v1346_v43  ;;  %v1115_v34 = vsub.f32 %v1083_v62, %v1099_v56 }
 0x2a8   :  { %v1355_v51 = vsel %vm1352_vm3, %v1354_v46, %v1350_v48  ;;  %v1335_v55 = vsel %vm1334_vm7, %v2892_v41, %v1331_v24  ;;  %vm1337_vm2 = vcmp.eq.f32.partialorder %v1336_v3, 8.507059e+37 }
 0x2a9   :  { %1374 = vperm.xlu0 %1543, %v1176_v2   ;;  %v1340_v12 = vsel %vm1337_vm2, %v1339_v57, %v1335_v55 }
 0x2aa   :  { %v1675_v36 = vpop.eup %1674  ;;  %1424 = vperm.xlu2 %1545, %v1326_v44   ;;  %v1341_v39 = vmul.f32 %v1340_v12, %v1115_v34 }
 0x2ab   :  { %v1020_v31 = vmul.f32 0.6931472, %v1675_v36 }
 0x2ad   :  { %v1036_v21 = vadd.f32 %v1020_v31, %v972_v33 }
 0x2af   :  { %v1100_v40 = vmul.f32 %v2824_v42, %v1036_v21 }
 0x2b1   :  { %1414 = vperm.xlu0 %1543, %v1296_v22   ;;  %v1116_v29 = vsub.f32 %v1084_v25, %v1100_v40 }
 0x2b3   :  { %v1356_v42 = vmul.f32 %v1355_v51, %v1116_v29 }
 0x2b5   :  { %1434 = vperm.xlu1 %1544, %v1356_v42  }
 0x2b9   :  { %1429 = vperm.xlu0 %1543, %v1341_v39  }
 0x2c5   :  { %v1380_v27 = vpop.permute.xlu2 %1379 }
 0x2c6   :  { %1441 = vst [vmem:[#allocation9 + $0x20] sm:$0xff] %v1380_v27 }
 0x2cd   :  { %v1365_v0 = vpop.permute.xlu2 %1364 }
 0x2ce   :  { %1438 = vst [vmem:[#allocation9 + $0x8] sm:$0xff] %v1365_v0 }
 0x2d7   :  { %v1360_v19 = vpop.permute.xlu0 %1359 }
 0x2d8   :  { %1437 = vst [vmem:[#allocation9] sm:$0xff] %v1360_v19 }
 0x2df   :  { %v1420_v28 = vpop.permute.xlu1 %1419  ;;  %v1400_v54 = vpop.permute.xlu0 %1399 }
 0x2e0   :  { %1449 = vst [vmem:[#allocation9 + $0x60] sm:$0xff] %v1420_v28 }
 0x2e1   :  { %1445 = vst [vmem:[#allocation9 + $0x40] sm:$0xff] %v1400_v54 }
 0x2e7   :  { %v1405_v6 = vpop.permute.xlu1 %1404  ;;  %v1385_v53 = vpop.permute.xlu0 %1384 }
 0x2e8   :  { %1446 = vst [vmem:[#allocation9 + $0x48] sm:$0xff] %v1405_v6 }
 0x2e9   :  { %1442 = vst [vmem:[#allocation9 + $0x28] sm:$0xff] %v1385_v53 }
 0x2f4   :  { %v1410_v41 = vpop.permute.xlu2 %1409  ;;  %v1370_v5 = vpop.permute.xlu1 %1369 }
 0x2f5   :  { %1447 = vst [vmem:[#allocation9 + $0x50] sm:$0xff] %v1410_v41 }
 0x2f6   :  { %1439 = vst [vmem:[#allocation9 + $0x10] sm:$0xff] %v1370_v5 }
 0x2fc   :  { %v1395_v60 = vpop.permute.xlu2 %1394  ;;  %v1390_v1 = vpop.permute.xlu1 %1389 }
 0x2fd   :  { %1444 = vst [vmem:[#allocation9 + $0x38] sm:$0xff] %v1395_v60 }
 0x2fe   :  { %1443 = vst [vmem:[#allocation9 + $0x30] sm:$0xff] %v1390_v1 }
 0x304   :  { %v1425_v17 = vpop.permute.xlu2 %1424 }
 0x305   :  { %1450 = vst [vmem:[#allocation9 + $0x68] sm:$0xff] %v1425_v17 }
 0x31b   :  { %v1375_v13 = vpop.permute.xlu0 %1374 }
 0x31c   :  { %1440 = vst [vmem:[#allocation9 + $0x18] sm:$0xff] %v1375_v13 }
 0x323   :  { %v1415_v49 = vpop.permute.xlu0 %1414 }
 0x324   :  { %1448 = vst [vmem:[#allocation9 + $0x58] sm:$0xff] %v1415_v49 }
 0x327   :  { %v1435_v15 = vpop.permute.xlu1 %1434 }
 0x328   :  { %1452 = vst [vmem:[#allocation9 + $0x78] sm:$0xff] %v1435_v15 }
 0x32b   :  { %v1430_v37 = vpop.permute.xlu0 %1429 }
 0x32c   :  { %1451 = vst [vmem:[#allocation9 + $0x70] sm:$0xff] %v1430_v37 }
 0x32d   :  { %1465 = dma.vmem_to_hbm [thread:$0]  %s1458_s4, 2048, %s1460_s19, [#allocation8], %s1729_s23, %s1729_s23, %s1730_s24  }
 0x32e   :  { %1726 = dma.done.wait [#allocation8], 2048  }
 0x32f   :  { %1727 = vsyncadd [#allocation8], 4294965248 }
 0x330   :  { %1470 = vsyncpa [#allocation7], 1 }
 0x331   :  { %1471 = vsyncpa [#allocation8], 1 }

</bundles_post_ra>
